<compile_context>
chip_gen: v7x
topology: tpu7x:2x2x1
jax: 0.10.0
libtpu: 0.0.40
codegen_flags: <defaults>
</compile_context>

<pallas_src>
import jax
import jax.numpy as jnp
from jax.experimental import pallas as pl
from jax.experimental.pallas import tpu as pltpu

# ---- hyperparameters (small shapes consistent with the module's forward) ----
B = 2               # batch
L = 12              # input_size (sequence length)
Lp = 16             # padded sequence length (tile aligned)
E = 32              # embed_size
WIN = 5             # local attention window (win_size)
PAD = (WIN - 1) // 2
CL = 16             # channels_local
CG = 8              # channels_global
F = CL + 3 * CG     # fc_input_size (= 40)
H = 32              # hidden_size
O = 8               # output_size
VOCAB = 50
V = VOCAB + 1       # embedding rows per tower

NR = 2 * B * Lp                 # 64 rows: [user b0 | user b1 | item b0 | item b1]
NPROJ = WIN + CL + (2 + 3 + 4) * CG   # 93 fused projection columns
NALL = NPROJ + Lp               # 109 = projections + global-attention taps
KOH = 104                       # one-hot width (2V=102, padded to x8)

# ---- single parameter slab layout (rows aligned to 8) ----
ROW_WALL = 0        # (2V, NALL)  fused [emb @ weights | emb_glo @ wga^T] table
ROW_MPOOL = 104     # (NR, NR)    per-(tower,batch) group-sum / broadcast matrix
ROW_ROWS = 168      # (NR, 98)    per-row constants: bla|bga|bias_cat|maskadd|dsel
ROW_W1 = 232        # (F, H)
ROW_B1 = 272        # (1, H)
ROW_W2 = 280        # (H, O)
ROW_B2 = 312        # (1, O)
SLAB_ROWS = 320
SLAB_COLS = 128


# ----------------------------------------------------------------------------
# Fused kernel: both towers + shared fcLayer + final elementwise dot.
# ----------------------------------------------------------------------------
def cnn_dlga_kernel(ids_ref, prm_ref, out_ref):
    # ---- static views into the single parameter slab ------------------------
    w_all = prm_ref[0:KOH, 0:NALL]                       # (104, 109)
    mpool = prm_ref[ROW_MPOOL:ROW_MPOOL + NR, 0:NR]      # (64, 64)
    rows = prm_ref[ROW_ROWS:ROW_ROWS + NR, 0:98]         # (64, 98)
    w1 = prm_ref[ROW_W1:ROW_W1 + F, 0:H]                 # (40, 32)
    b1 = prm_ref[ROW_B1:ROW_B1 + 1, 0:H]                 # (1, 32)
    w2 = prm_ref[ROW_W2:ROW_W2 + H, 0:O]                 # (32, 8)
    b2 = prm_ref[ROW_B2:ROW_B2 + 1, 0:O]                 # (1, 8)

    bla = rows[:, 0:1]                  # local attention bias per row
    bga = rows[:, 1:2]                  # global attention bias per row
    bias_cat = rows[:, 2:2 + F]         # [blc | bg2 | bg3 | bg4] per row
    maskadd = rows[:, 42:42 + F]        # 0 for valid rows, -4 for invalid rows
    dsel = rows[:, 82:82 + Lp]          # selects wga tap of the row's position

    # ---- fused embedding gather + every conv/attention projection -----------
    ids = ids_ref[...]                                                 # (64, 1)
    onehot = (ids == jax.lax.broadcasted_iota(jnp.int32, (NR, KOH), 1)
              ).astype(jnp.float32)                                    # (64, 104)
    pall = jnp.dot(onehot, w_all, preferred_element_type=jnp.float32)  # (64, 109)
    p = pall[:, 0:NPROJ]        # [taps(5) | local conv(16) | wg2/wg3/wg4(72)]
    qg = pall[:, NPROJ:NALL]    # eglo . wga[pos] for every window position

    # ---- GlobalAttention gate: one matmul pools + broadcasts per group ------
    gpool = jnp.sum(jnp.dot(mpool, qg * dsel, preferred_element_type=jnp.float32),
                    axis=1, keepdims=True)                             # (64, 1)
    gate = jax.nn.sigmoid(gpool + bga)                                 # (64, 1)

    # ---- whole-block row shifts (wrapped rows land on zero padding rows) ----
    def shift_rows(x, j):               # result[i] = x[(i + j) % NR]
        j = j % NR
        return jnp.concatenate([x[j:, :], x[:j, :]], axis=0)

    u2 = shift_rows(p, -2)
    u1 = shift_rows(p, -1)
    d1 = shift_rows(p, 1)
    d2 = shift_rows(p, 2)
    d3 = shift_rows(p, 3)

    # ---- LocalAttention window score + gate ----------------------------------
    score = u2[:, 0:1] + u1[:, 1:2] + p[:, 2:3] + d1[:, 3:4] + d2[:, 4:5]
    sig = jax.nn.sigmoid(score + bla)                                  # (64, 1)

    # ---- global conv banks (k = 2, 3, 4) as shifted adds ---------------------
    acc2 = p[:, 21:29] + d1[:, 29:37]
    acc3 = p[:, 37:45] + d1[:, 45:53] + d2[:, 53:61]
    acc4 = p[:, 61:69] + d1[:, 69:77] + d2[:, 77:85] + d3[:, 85:93]

    z = jnp.concatenate(
        [sig * p[:, 5:21],
         gate * jnp.concatenate([acc2, acc3, acc4], axis=1)], axis=1) + bias_cat
    h = jnp.tanh(z) + maskadd                                          # (64, 40)

    # ---- per-(tower, batch) max-pool over the padded sequence ----------------
    feats = jnp.concatenate(
        [jnp.max(h[g * Lp:(g + 1) * Lp, :], axis=0, keepdims=True)
         for g in range(2 * B)], axis=0)                               # (4, 40)

    # ---- shared fcLayer on both towers at once + final elementwise dot -------
    # TODO(synk): nn.Dropout(0.5) treated as identity (eval-mode forward).
    hid = jnp.maximum(
        jnp.dot(feats, w1, preferred_element_type=jnp.float32) + b1, 0.0)
    outp = jnp.dot(hid, w2, preferred_element_type=jnp.float32) + b2   # (4, 8)
    out_ref[...] = jnp.sum(outp[0:B, :] * outp[B:2 * B, :], axis=1, keepdims=True)


# ----------------------------------------------------------------------------
# One-time parameter packing (hoisted out of the per-forward path).
# ----------------------------------------------------------------------------
def pack_params(params):
    """Build the single (SLAB_ROWS, 128) f32 parameter slab.  Call once."""

    def tower_blocks(tp):
        lw = jnp.concatenate([tp['wla'].T, tp['wlc']], axis=1)          # (E, 21)
        gw = jnp.concatenate([tp['wg2'][0], tp['wg2'][1],
                              tp['wg3'][0], tp['wg3'][1], tp['wg3'][2],
                              tp['wg4'][0], tp['wg4'][1], tp['wg4'][2],
                              tp['wg4'][3]], axis=1)                    # (E, 72)
        wfused = jnp.concatenate([tp['emb_loc'] @ lw,
                                  tp['emb_glo'] @ gw], axis=1)          # (V, 93)
        gcat = jnp.pad(tp['emb_glo'] @ tp['wga'].T, ((0, 0), (0, Lp - L)))  # (V, 16)
        wall = jnp.concatenate([wfused, gcat], axis=1)                  # (V, 109)
        bias_cat = jnp.concatenate(
            [tp['blc'], tp['bg2'], tp['bg3'], tp['bg4']], axis=1)       # (1, 40)
        return wall, tp['bla'][0, 0], tp['bga'][0, 0], bias_cat

    wall_u, bla_u, bga_u, bc_u = tower_blocks(params['user'])
    wall_i, bla_i, bga_i, bc_i = tower_blocks(params['item'])

    slab = jnp.zeros((SLAB_ROWS, SLAB_COLS), jnp.float32)
    slab = slab.at[0:2 * V, 0:NALL].set(jnp.concatenate([wall_u, wall_i], axis=0))

    ridx = jnp.arange(NR, dtype=jnp.int32)
    mpool = (ridx[:, None] // Lp == ridx[None, :] // Lp).astype(jnp.float32)
    slab = slab.at[ROW_MPOOL:ROW_MPOOL + NR, 0:NR].set(mpool)

    is_user = ridx < (NR // 2)
    rpos = ridx % Lp
    bla_rows = jnp.where(is_user, bla_u, bla_i)[:, None]
    bga_rows = jnp.where(is_user, bga_u, bga_i)[:, None]
    bias_rows = jnp.where(is_user[:, None],
                          jnp.broadcast_to(bc_u, (NR, F)),
                          jnp.broadcast_to(bc_i, (NR, F)))
    limits = jnp.concatenate([jnp.full((CL,), L, jnp.int32),
                              jnp.full((CG,), L - 1, jnp.int32),
                              jnp.full((CG,), L - 2, jnp.int32),
                              jnp.full((CG,), L - 3, jnp.int32)])
    maskadd = jnp.where(rpos[:, None] < limits[None, :], 0.0, -4.0)
    dsel = (rpos[:, None] == jnp.arange(Lp)[None, :]).astype(jnp.float32)
    rows_blk = jnp.concatenate([bla_rows, bga_rows, bias_rows, maskadd, dsel],
                               axis=1)                                  # (64, 98)
    slab = slab.at[ROW_ROWS:ROW_ROWS + NR, 0:98].set(rows_blk)

    slab = slab.at[ROW_W1:ROW_W1 + F, 0:H].set(params['w1'])
    slab = slab.at[ROW_B1:ROW_B1 + 1, 0:H].set(params['b1'])
    slab = slab.at[ROW_W2:ROW_W2 + H, 0:O].set(params['w2'])
    slab = slab.at[ROW_B2:ROW_B2 + 1, 0:O].set(params['b2'])
    return slab


# ----------------------------------------------------------------------------
# Forward wrapper: minimal per-call host work + a single pallas_call.
# ----------------------------------------------------------------------------
def _prep_ids(x_user, x_item):
    u = jnp.pad(x_user.astype(jnp.int32), ((0, 0), (0, Lp - L)), constant_values=-1)
    it = jnp.pad(x_item.astype(jnp.int32) + V, ((0, 0), (0, Lp - L)),
                 constant_values=-1)
    return jnp.concatenate([u, it], axis=0).reshape(NR, 1)


def cnn_dlga_forward(x_user, x_item, param_slab):
    ids = _prep_ids(x_user, x_item)

    flops = (2 * NR * KOH * NALL + 2 * NR * NR * Lp
             + 2 * (2 * B) * F * H + 2 * (2 * B) * H * O)
    transcendentals = NR * F + 2 * NR
    bytes_accessed = SLAB_ROWS * SLAB_COLS * 4 + NR * 4 + B * 4

    out = pl.pallas_call(
        cnn_dlga_kernel,
        out_shape=jax.ShapeDtypeStruct((B, 1), jnp.float32),
        grid=(1,),
        in_specs=[pl.BlockSpec((NR, 1), lambda i: (0, 0)),
                  pl.BlockSpec((SLAB_ROWS, SLAB_COLS), lambda i: (0, 0))],
        out_specs=pl.BlockSpec((B, 1), lambda i: (0, 0)),
        compiler_params=pltpu.CompilerParams(dimension_semantics=("arbitrary",)),
        cost_estimate=pl.CostEstimate(flops=flops,
                                      transcendentals=transcendentals,
                                      bytes_accessed=bytes_accessed),
    )(ids, param_slab)
    return out[:, 0]


# ----------------------------------------------------------------------------
# Parameters (deterministic synthetic init).
# ----------------------------------------------------------------------------
def init_params(key):
    keys = iter(jax.random.split(key, 32))

    def nrm(shape, scale=0.1):
        return (scale * jax.random.normal(next(keys), shape)).astype(jnp.float32)

    def tower_params():
        return dict(
            emb_loc=nrm((V, E)),                    # LocalAttention.embedding
            emb_glo=nrm((V, E)),                    # GlobalAttention.embedding
            wla=nrm((WIN, E)), bla=nrm((1, 1)),     # local attention Conv2d(1,1,(WIN,E))
            wlc=nrm((E, CL)), blc=nrm((1, CL)),     # local cnn Conv2d(1,CL,(1,E))
            wga=nrm((L, E)), bga=nrm((1, 1)),       # global attention Conv2d(1,1,(L,E))
            wg2=nrm((2, E, CG)), bg2=nrm((1, CG)),  # cnn_1 Conv2d(1,CG,(2,E))
            wg3=nrm((3, E, CG)), bg3=nrm((1, CG)),  # cnn_2 Conv2d(1,CG,(3,E))
            wg4=nrm((4, E, CG)), bg4=nrm((1, CG)),  # cnn_3 Conv2d(1,CG,(4,E))
        )

    return dict(user=tower_params(), item=tower_params(),
                w1=nrm((F, H)), b1=nrm((1, H)),
                w2=nrm((H, O)), b2=nrm((1, O)))


# ----------------------------------------------------------------------------
# Pure-JAX reference (mirrors the PyTorch module; for correctness check only).
# ----------------------------------------------------------------------------
def ref_forward(x_user, x_item, params):
    def tower(x, tp):
        eloc = tp['emb_loc'][x]
        pad = jnp.zeros((x.shape[0], PAD, E), jnp.float32)
        epad = jnp.concatenate([pad, eloc, pad], axis=1)
        scores = jnp.stack(
            [jnp.sum(epad[:, i:i + WIN, :] * tp['wla'][None], axis=(1, 2))
             for i in range(L)], axis=1) + tp['bla'][0, 0]
        sig = jax.nn.sigmoid(scores)[:, :, None]
        wloc = eloc * sig
        hl = jnp.tanh(jnp.einsum('ble,ec->blc', wloc, tp['wlc']) + tp['blc'][0])
        local = jnp.max(hl, axis=1)

        eglo = tp['emb_glo'][x]
        gscore = jax.nn.sigmoid(jnp.sum(eglo * tp['wga'][None], axis=(1, 2))
                                + tp['bga'][0, 0])
        wg = eglo * gscore[:, None, None]

        def branch(w, b, k):
            lo = L - k + 1
            acc = sum(jnp.einsum('ble,ec->blc', wg[:, j:j + lo, :], w[j])
                      for j in range(k))
            return jnp.max(jnp.tanh(acc + b[0]), axis=1)

        g1 = branch(tp['wg2'], tp['bg2'], 2)
        g2 = branch(tp['wg3'], tp['bg3'], 3)
        g3 = branch(tp['wg4'], tp['bg4'], 4)
        return jnp.concatenate([local, g1, g2, g3], axis=1)

    fu = tower(x_user, params['user'])
    fi = tower(x_item, params['item'])

    def mlp(v):
        h = jnp.maximum(v @ params['w1'] + params['b1'][0], 0.0)
        return h @ params['w2'] + params['b2'][0]

    return jnp.sum(mlp(fu) * mlp(fi), axis=1)


if __name__ == "__main__":
    key = jax.random.PRNGKey(0)
    kp, ku, ki = jax.random.split(key, 3)
    params = init_params(kp)
    x_user = jax.random.randint(ku, (B, L), 0, V, dtype=jnp.int32)
    x_item = jax.random.randint(ki, (B, L), 0, V, dtype=jnp.int32)

    # parameter-only packing: done ONCE, reused across forward calls
    slab = jax.block_until_ready(pack_params(params))

    fwd = jax.jit(cnn_dlga_forward)
    out = fwd(x_user, x_item, slab)
    jax.block_until_ready(out)

    ref = ref_forward(x_user, x_item, params)
    assert out.shape == (B,), out.shape
    assert jnp.allclose(out, ref, rtol=1e-3, atol=1e-4), (out, ref)
    print("KERNEL_OK")
</pallas_src>

<mosaic_0001>
module attributes {stable_mosaic.version = 11 : i64} {
  func.func @cnn_dlga_kernel(%arg0: i32, %arg1: memref<64x1xi32, #tpu.memory_space<vmem>>, %arg2: memref<320x128xf32, #tpu.memory_space<vmem>>, %arg3: memref<2x1xf32, #tpu.memory_space<vmem>>) attributes {dimension_semantics = [#tpu.dimension_semantics<arbitrary>], iteration_bounds = array<i64: 1>, scalar_prefetch = 0 : i64, scratch_operands = 0 : i64, tpu.core_type = #tpu.core_type<tc>, window_params = [{pipeline_mode = #tpu.pipeline_mode<synchronous>, transform_indices = @transform_0, window_bounds = array<i64: 64, 1>}, {pipeline_mode = #tpu.pipeline_mode<synchronous>, transform_indices = @transform_1, window_bounds = array<i64: 320, 128>}, {pipeline_mode = #tpu.pipeline_mode<synchronous>, transform_indices = @transform_2, window_bounds = array<i64: 2, 1>}]} {
    %c0 = arith.constant 0 : index
    %c0_0 = arith.constant 0 : index
    %0 = vector.load %arg2[%c0, %c0_0] : memref<320x128xf32, #tpu.memory_space<vmem>>, vector<104x109xf32>
    %c104 = arith.constant 104 : index
    %c0_1 = arith.constant 0 : index
    %1 = vector.load %arg2[%c104, %c0_1] : memref<320x128xf32, #tpu.memory_space<vmem>>, vector<64x64xf32>
    %c168 = arith.constant 168 : index
    %c0_2 = arith.constant 0 : index
    %2 = vector.load %arg2[%c168, %c0_2] : memref<320x128xf32, #tpu.memory_space<vmem>>, vector<64x98xf32>
    %c232 = arith.constant 232 : index
    %c0_3 = arith.constant 0 : index
    %3 = vector.load %arg2[%c232, %c0_3] : memref<320x128xf32, #tpu.memory_space<vmem>>, vector<40x32xf32>
    %c272 = arith.constant 272 : index
    %c0_4 = arith.constant 0 : index
    %4 = vector.load %arg2[%c272, %c0_4] : memref<320x128xf32, #tpu.memory_space<vmem>>, vector<1x32xf32>
    %c280 = arith.constant 280 : index
    %c0_5 = arith.constant 0 : index
    %5 = vector.load %arg2[%c280, %c0_5] : memref<320x128xf32, #tpu.memory_space<vmem>>, vector<32x8xf32>
    %c312 = arith.constant 312 : index
    %c0_6 = arith.constant 0 : index
    %6 = vector.load %arg2[%c312, %c0_6] : memref<320x128xf32, #tpu.memory_space<vmem>>, vector<1x8xf32>
    %7 = vector.extract_strided_slice %2 {offsets = [0, 0], sizes = [64, 1], strides = [1, 1]} : vector<64x98xf32> to vector<64x1xf32>
    %8 = vector.extract_strided_slice %2 {offsets = [0, 1], sizes = [64, 1], strides = [1, 1]} : vector<64x98xf32> to vector<64x1xf32>
    %9 = vector.extract_strided_slice %2 {offsets = [0, 2], sizes = [64, 40], strides = [1, 1]} : vector<64x98xf32> to vector<64x40xf32>
    %10 = vector.extract_strided_slice %2 {offsets = [0, 42], sizes = [64, 40], strides = [1, 1]} : vector<64x98xf32> to vector<64x40xf32>
    %11 = vector.extract_strided_slice %2 {offsets = [0, 82], sizes = [64, 16], strides = [1, 1]} : vector<64x98xf32> to vector<64x16xf32>
    %c0_7 = arith.constant 0 : index
    %c0_8 = arith.constant 0 : index
    %12 = vector.load %arg1[%c0_7, %c0_8] : memref<64x1xi32, #tpu.memory_space<vmem>>, vector<64x1xi32>
    %13 = tpu.iota {dimensions = array<i32: 1>} : vector<64x104xi32>
    %14 = vector.broadcast %12 : vector<64x1xi32> to vector<64x104xi32>
    %15 = arith.cmpi eq, %14, %13 : vector<64x104xi32>
    %16 = arith.extui %15 : vector<64x104xi1> to vector<64x104xi32>
    %17 = arith.sitofp %16 : vector<64x104xi32> to vector<64x104xf32>
    %cst = arith.constant dense<0.000000e+00> : vector<64x109xf32>
    %18 = tpu.matmul %17, %0, %cst {dimension_numbers = #tpu.dot_dimension_numbers<[1], [0], [0], [1], [0, 0, 1, 1], [], []>} : vector<64x104xf32>, vector<104x109xf32>, vector<64x109xf32> -> vector<64x109xf32>
    %19 = vector.extract_strided_slice %18 {offsets = [0, 0], sizes = [64, 93], strides = [1, 1]} : vector<64x109xf32> to vector<64x93xf32>
    %20 = vector.extract_strided_slice %18 {offsets = [0, 93], sizes = [64, 16], strides = [1, 1]} : vector<64x109xf32> to vector<64x16xf32>
    %21 = arith.mulf %20, %11 : vector<64x16xf32>
    %cst_9 = arith.constant dense<0.000000e+00> : vector<64x16xf32>
    %22 = tpu.matmul %1, %21, %cst_9 {dimension_numbers = #tpu.dot_dimension_numbers<[1], [0], [0], [1], [0, 0, 1, 1], [], []>} : vector<64x64xf32>, vector<64x16xf32>, vector<64x16xf32> -> vector<64x16xf32>
    %cst_10 = arith.constant dense<0.000000e+00> : vector<64xf32>
    %23 = vector.multi_reduction <add>, %22, %cst_10 [1] : vector<64x16xf32> to vector<64xf32>
    %24 = vector.shape_cast %23 : vector<64xf32> to vector<64x1xf32>
    %25 = arith.addf %24, %8 : vector<64x1xf32>
    %26 = arith.negf %25 : vector<64x1xf32>
    %27 = math.exp %26 : vector<64x1xf32>
    %cst_11 = arith.constant 1.000000e+00 : f32
    %28 = vector.broadcast %cst_11 : f32 to vector<64x1xf32>
    %29 = arith.addf %28, %27 : vector<64x1xf32>
    %30 = arith.divf %28, %29 : vector<64x1xf32>
    %31 = vector.extract_strided_slice %19 {offsets = [62, 0], sizes = [2, 93], strides = [1, 1]} : vector<64x93xf32> to vector<2x93xf32>
    %32 = vector.extract_strided_slice %19 {offsets = [0, 0], sizes = [62, 93], strides = [1, 1]} : vector<64x93xf32> to vector<62x93xf32>
    %33 = tpu.concatenate %31, %32 in 0 : vector<2x93xf32>, vector<62x93xf32> -> vector<64x93xf32>
    %34 = vector.extract_strided_slice %19 {offsets = [63, 0], sizes = [1, 93], strides = [1, 1]} : vector<64x93xf32> to vector<1x93xf32>
    %35 = vector.extract_strided_slice %19 {offsets = [0, 0], sizes = [63, 93], strides = [1, 1]} : vector<64x93xf32> to vector<63x93xf32>
    %36 = tpu.concatenate %34, %35 in 0 : vector<1x93xf32>, vector<63x93xf32> -> vector<64x93xf32>
    %37 = vector.extract_strided_slice %19 {offsets = [1, 0], sizes = [63, 93], strides = [1, 1]} : vector<64x93xf32> to vector<63x93xf32>
    %38 = vector.extract_strided_slice %19 {offsets = [0, 0], sizes = [1, 93], strides = [1, 1]} : vector<64x93xf32> to vector<1x93xf32>
    %39 = tpu.concatenate %37, %38 in 0 : vector<63x93xf32>, vector<1x93xf32> -> vector<64x93xf32>
    %40 = vector.extract_strided_slice %19 {offsets = [2, 0], sizes = [62, 93], strides = [1, 1]} : vector<64x93xf32> to vector<62x93xf32>
    %41 = vector.extract_strided_slice %19 {offsets = [0, 0], sizes = [2, 93], strides = [1, 1]} : vector<64x93xf32> to vector<2x93xf32>
    %42 = tpu.concatenate %40, %41 in 0 : vector<62x93xf32>, vector<2x93xf32> -> vector<64x93xf32>
    %43 = vector.extract_strided_slice %19 {offsets = [3, 0], sizes = [61, 93], strides = [1, 1]} : vector<64x93xf32> to vector<61x93xf32>
    %44 = vector.extract_strided_slice %19 {offsets = [0, 0], sizes = [3, 93], strides = [1, 1]} : vector<64x93xf32> to vector<3x93xf32>
    %45 = tpu.concatenate %43, %44 in 0 : vector<61x93xf32>, vector<3x93xf32> -> vector<64x93xf32>
    %46 = vector.extract_strided_slice %33 {offsets = [0, 0], sizes = [64, 1], strides = [1, 1]} : vector<64x93xf32> to vector<64x1xf32>
    %47 = vector.extract_strided_slice %36 {offsets = [0, 1], sizes = [64, 1], strides = [1, 1]} : vector<64x93xf32> to vector<64x1xf32>
    %48 = arith.addf %46, %47 : vector<64x1xf32>
    %49 = vector.extract_strided_slice %19 {offsets = [0, 2], sizes = [64, 1], strides = [1, 1]} : vector<64x93xf32> to vector<64x1xf32>
    %50 = arith.addf %48, %49 : vector<64x1xf32>
    %51 = vector.extract_strided_slice %39 {offsets = [0, 3], sizes = [64, 1], strides = [1, 1]} : vector<64x93xf32> to vector<64x1xf32>
    %52 = arith.addf %50, %51 : vector<64x1xf32>
    %53 = vector.extract_strided_slice %42 {offsets = [0, 4], sizes = [64, 1], strides = [1, 1]} : vector<64x93xf32> to vector<64x1xf32>
    %54 = arith.addf %52, %53 : vector<64x1xf32>
    %55 = arith.addf %54, %7 : vector<64x1xf32>
    %56 = arith.negf %55 : vector<64x1xf32>
    %57 = math.exp %56 : vector<64x1xf32>
    %cst_12 = arith.constant 1.000000e+00 : f32
    %58 = vector.broadcast %cst_12 : f32 to vector<64x1xf32>
    %59 = arith.addf %58, %57 : vector<64x1xf32>
    %60 = arith.divf %58, %59 : vector<64x1xf32>
    %61 = vector.extract_strided_slice %19 {offsets = [0, 21], sizes = [64, 8], strides = [1, 1]} : vector<64x93xf32> to vector<64x8xf32>
    %62 = vector.extract_strided_slice %39 {offsets = [0, 29], sizes = [64, 8], strides = [1, 1]} : vector<64x93xf32> to vector<64x8xf32>
    %63 = arith.addf %61, %62 : vector<64x8xf32>
    %64 = vector.extract_strided_slice %19 {offsets = [0, 37], sizes = [64, 8], strides = [1, 1]} : vector<64x93xf32> to vector<64x8xf32>
    %65 = vector.extract_strided_slice %39 {offsets = [0, 45], sizes = [64, 8], strides = [1, 1]} : vector<64x93xf32> to vector<64x8xf32>
    %66 = arith.addf %64, %65 : vector<64x8xf32>
    %67 = vector.extract_strided_slice %42 {offsets = [0, 53], sizes = [64, 8], strides = [1, 1]} : vector<64x93xf32> to vector<64x8xf32>
    %68 = arith.addf %66, %67 : vector<64x8xf32>
    %69 = vector.extract_strided_slice %19 {offsets = [0, 61], sizes = [64, 8], strides = [1, 1]} : vector<64x93xf32> to vector<64x8xf32>
    %70 = vector.extract_strided_slice %39 {offsets = [0, 69], sizes = [64, 8], strides = [1, 1]} : vector<64x93xf32> to vector<64x8xf32>
    %71 = arith.addf %69, %70 : vector<64x8xf32>
    %72 = vector.extract_strided_slice %42 {offsets = [0, 77], sizes = [64, 8], strides = [1, 1]} : vector<64x93xf32> to vector<64x8xf32>
    %73 = arith.addf %71, %72 : vector<64x8xf32>
    %74 = vector.extract_strided_slice %45 {offsets = [0, 85], sizes = [64, 8], strides = [1, 1]} : vector<64x93xf32> to vector<64x8xf32>
    %75 = arith.addf %73, %74 : vector<64x8xf32>
    %76 = vector.extract_strided_slice %19 {offsets = [0, 5], sizes = [64, 16], strides = [1, 1]} : vector<64x93xf32> to vector<64x16xf32>
    %77 = vector.broadcast %60 : vector<64x1xf32> to vector<64x16xf32>
    %78 = arith.mulf %77, %76 : vector<64x16xf32>
    %79 = tpu.concatenate %63, %68, %75 in 1 : vector<64x8xf32>, vector<64x8xf32>, vector<64x8xf32> -> vector<64x24xf32>
    %80 = vector.broadcast %30 : vector<64x1xf32> to vector<64x24xf32>
    %81 = arith.mulf %80, %79 : vector<64x24xf32>
    %82 = tpu.concatenate %78, %81 in 1 : vector<64x16xf32>, vector<64x24xf32> -> vector<64x40xf32>
    %83 = arith.addf %82, %9 : vector<64x40xf32>
    %84 = math.tanh %83 : vector<64x40xf32>
    %85 = arith.addf %84, %10 : vector<64x40xf32>
    %86 = vector.extract_strided_slice %85 {offsets = [0, 0], sizes = [16, 40], strides = [1, 1]} : vector<64x40xf32> to vector<16x40xf32>
    %cst_13 = arith.constant dense<0xFF800000> : vector<40xf32>
    %87 = vector.multi_reduction <maximumf>, %86, %cst_13 [0] : vector<16x40xf32> to vector<40xf32>
    %88 = vector.shape_cast %87 : vector<40xf32> to vector<1x40xf32>
    %89 = vector.extract_strided_slice %85 {offsets = [16, 0], sizes = [16, 40], strides = [1, 1]} : vector<64x40xf32> to vector<16x40xf32>
    %cst_14 = arith.constant dense<0xFF800000> : vector<40xf32>
    %90 = vector.multi_reduction <maximumf>, %89, %cst_14 [0] : vector<16x40xf32> to vector<40xf32>
    %91 = vector.shape_cast %90 : vector<40xf32> to vector<1x40xf32>
    %92 = vector.extract_strided_slice %85 {offsets = [32, 0], sizes = [16, 40], strides = [1, 1]} : vector<64x40xf32> to vector<16x40xf32>
    %cst_15 = arith.constant dense<0xFF800000> : vector<40xf32>
    %93 = vector.multi_reduction <maximumf>, %92, %cst_15 [0] : vector<16x40xf32> to vector<40xf32>
    %94 = vector.shape_cast %93 : vector<40xf32> to vector<1x40xf32>
    %95 = vector.extract_strided_slice %85 {offsets = [48, 0], sizes = [16, 40], strides = [1, 1]} : vector<64x40xf32> to vector<16x40xf32>
    %cst_16 = arith.constant dense<0xFF800000> : vector<40xf32>
    %96 = vector.multi_reduction <maximumf>, %95, %cst_16 [0] : vector<16x40xf32> to vector<40xf32>
    %97 = vector.shape_cast %96 : vector<40xf32> to vector<1x40xf32>
    %98 = tpu.concatenate %88, %91, %94, %97 in 0 : vector<1x40xf32>, vector<1x40xf32>, vector<1x40xf32>, vector<1x40xf32> -> vector<4x40xf32>
    %cst_17 = arith.constant dense<0.000000e+00> : vector<4x32xf32>
    %99 = tpu.matmul %98, %3, %cst_17 {dimension_numbers = #tpu.dot_dimension_numbers<[1], [0], [0], [1], [0, 0, 1, 1], [], []>} : vector<4x40xf32>, vector<40x32xf32>, vector<4x32xf32> -> vector<4x32xf32>
    %100 = vector.broadcast %4 : vector<1x32xf32> to vector<4x32xf32>
    %101 = arith.addf %99, %100 : vector<4x32xf32>
    %cst_18 = arith.constant 0.000000e+00 : f32
    %102 = vector.broadcast %cst_18 : f32 to vector<4x32xf32>
    %103 = arith.maximumf %101, %102 : vector<4x32xf32>
    %cst_19 = arith.constant dense<0.000000e+00> : vector<4x8xf32>
    %104 = tpu.matmul %103, %5, %cst_19 {dimension_numbers = #tpu.dot_dimension_numbers<[1], [0], [0], [1], [0, 0, 1, 1], [], []>} : vector<4x32xf32>, vector<32x8xf32>, vector<4x8xf32> -> vector<4x8xf32>
    %105 = vector.broadcast %6 : vector<1x8xf32> to vector<4x8xf32>
    %106 = arith.addf %104, %105 : vector<4x8xf32>
    %107 = vector.extract_strided_slice %106 {offsets = [0, 0], sizes = [2, 8], strides = [1, 1]} : vector<4x8xf32> to vector<2x8xf32>
    %108 = vector.extract_strided_slice %106 {offsets = [2, 0], sizes = [2, 8], strides = [1, 1]} : vector<4x8xf32> to vector<2x8xf32>
    %109 = arith.mulf %107, %108 : vector<2x8xf32>
    %cst_20 = arith.constant dense<0.000000e+00> : vector<2xf32>
    %110 = vector.multi_reduction <add>, %109, %cst_20 [1] : vector<2x8xf32> to vector<2xf32>
    %111 = vector.shape_cast %110 : vector<2xf32> to vector<2x1xf32>
    %c0_21 = arith.constant 0 : index
    %c0_22 = arith.constant 0 : index
    %112 = vector.load %arg3[%c0_21, %c0_22] : memref<2x1xf32, #tpu.memory_space<vmem>>, vector<2x1xf32>
    tpu.vector_store %arg3[%c0_21, %c0_22], %111 {strides = array<i32>} : memref<2x1xf32, #tpu.memory_space<vmem>>, vector<2x1xf32>,
    return
  }
  func.func @transform_0(%arg0: i32) -> (i32, i32) {
    %c0_i32 = arith.constant 0 : i32
    %c0_i32_0 = arith.constant 0 : i32
    %c0_i32_1 = arith.constant 0 : i32
    return %c0_i32, %c0_i32_0 : i32, i32
  }
  func.func @transform_1(%arg0: i32) -> (i32, i32) {
    %c0_i32 = arith.constant 0 : i32
    %c0_i32_0 = arith.constant 0 : i32
    %c0_i32_1 = arith.constant 0 : i32
    return %c0_i32, %c0_i32_0 : i32, i32
  }
  func.func @transform_2(%arg0: i32) -> (i32, i32) {
    %c0_i32 = arith.constant 0 : i32
    %c0_i32_0 = arith.constant 0 : i32
    %c0_i32_1 = arith.constant 0 : i32
    return %c0_i32, %c0_i32_0 : i32, i32
  }
}

</mosaic_0001>

<bundles_post_ra>
// kernel: cnn_dlga_forward.1
= control target key start
LH: loop header
LB: loop body
LE: loop exit
PB: predicated region body
PF: predicated region fallthrough
CT: control target
= control target key end

     0   :  { %7 = vsyncpa [#allocation3], 0  ;;  %s1888_s9 = smov [#allocation2]   ;;  %s2642_s0 = inlined_call_operand.vmem [shape: s32[64,1], index: 0, kind: input, shape index: {}]   ;;  %s2643_s1 = inlined_call_operand.hbm [shape: f32[320,128], index: 1, kind: input, shape index: {}]   ;;  %s2644_s2 = inlined_call_operand.vmem [shape: f32[2,1], index: 2, kind: output, shape index: {}]  }
   0x1   :  { %s15_s10 = sshll.u32 %s1888_s9, 4  ;;  %s1864_s13 = scalar_lea.hbm %s2643_s1, 5120  ;;  %s16_s10 = int_to_ptr.vmem [resolvable:$true] %s15_s10 }
   0x2   :  { %p1865_p0 = scmp.ne.s32.totalorder %s2643_s1, %s1864_s13  ;;  %p1868_p1 = scmp.lt.u32.totalorder %s1864_s13, %s2643_s1 }
   0x4   :  { %p1870_p2 = pnand %p1868_p1, %p1865_p0 }
   0x6   :  { %1873 = shalt.err (!%p1870_p2)
}
   0x7   :  { %s1874_s18 = scalar_lea.vmem %s16_s10, 5120  ;;  %p1879_p4 = scmp.lt.s32.totalorder %s16_s10, %s16_s10 }
   0x8   :  { %p1875_p3 = scmp.ne.s32.totalorder %s16_s10, %s1874_s18  ;;  %p1880_p5 = scmp.lt.s32.totalorder %s1874_s18, %s1874_s18 }
   0xa   :  { %p1881_p6 = por %p1880_p5, %p1879_p4 }
   0xc   :  { %p1882_p7 = pnand %p1881_p6, %p1875_p3 }
   0xe   :  { %1885 = shalt.err (!%p1882_p7)
}
   0xf   :  { %s1889_s19 = smov 128   ;;  %s1890_s20 = smov 8  }
  0x10   :  { %21 = dma.hbm_to_vmem [thread:$0]  %s2643_s1, 5120, %s16_s10, [#allocation3], %s1889_s19, %s1889_s19, %s1890_s20  }
  0x11   :  { %1886 = dma.done.wait [#allocation3], 5120  }
  0x12   :  { %1887 = vsyncadd [#allocation3], 4294962176  ;;  %v1891_v0 = vmov 0   ;;  %v67_v1 = vld [vmem:[%s2642_s0 + $0x10] sm:$0xff]  ;;  %v65_v2 = vld [vmem:[%s2642_s0] sm:$0xff]  ;;  %v73_v36 = vlaneseq  ;;  %vm123_vm0 = vcmask 850944  }
  0x13   :  { %1753 = vset.pattern.permute.xlu1 %v1891_v0  ;;  %1752 = vset.pattern.permute.xlu0 %v1891_v0  ;;  %v68_v3 = vld [vmem:[%s2642_s0 + $0x18] sm:$0xff]  ;;  %v66_v4 = vld [vmem:[%s2642_s0 + $0x8] sm:$0xff]  ;;  %v25_v5 = vld [vmem:[#allocation2] sm:$0xff]  ;;  %v2645_v40 = vmov 0.0   ;;  %vm572_vm9 = vcmask 1040384   ;;  %vm589_vm10 = vcmask 1046528  }
  0x14   :  { %82 = vperm.xlu1 %1753, %v67_v1   ;;  %76 = vperm.xlu0 %1752, %v65_v2   ;;  %v26_v6 = vld [vmem:[#allocation2 + $0x8] sm:$0xff]  ;;  %v27_v7 = vld [vmem:[#allocation2 + $0x10] sm:$0xff]  ;;  %v28_v8 = vld [vmem:[#allocation2 + $0x18] sm:$0xff]  ;;  %v74_v37 = vand.u32 127, %v73_v36  ;;  %vm608_vm11 = vcmask 1045504   ;;  %vm627_vm12 = vcmask 1044480  }
  0x15   :  { %v1677_v9 = vpack.c.bf16 %v26_v6, %v25_v5  ;;  %v1681_v10 = vpack.c.bf16 %v28_v8, %v27_v7  ;;  %v29_v11 = vld [vmem:[#allocation2 + $0x20] sm:$0xff]  ;;  %v30_v12 = vld [vmem:[#allocation2 + $0x28] sm:$0xff]  ;;  %v31_v16 = vld [vmem:[#allocation2 + $0x30] sm:$0xff]  ;;  %vm546_vm13 = vcmask 1041408   ;;  %s1894_s10 = smov 35   ;;  %s1895_s11 = smov 127  }
  0x16   :  { %v70_v13 = vld [vmem:[%s2642_s0 + $0x28] sm:$0xff]  ;;  %v69_v14 = vld [vmem:[%s2642_s0 + $0x20] sm:$0xff]  ;;  %v1685_v15 = vpack.c.bf16 %v30_v12, %v29_v11  ;;  %v32_v17 = vld [vmem:[#allocation2 + $0x38] sm:$0xff]  ;;  %vm325_vm14 = vcmask 523264   ;;  %s1896_s12 = smov 126   ;;  %s1897_s13 = smov 125  }
  0x17   :  { %1678 = vmatprep.subr.bf16.mxu0 %v1677_v9  ;;  %v72_v18 = vld [vmem:[%s2642_s0 + $0x38] sm:$0xff]  ;;  %v71_v19 = vld [vmem:[%s2642_s0 + $0x30] sm:$0xff]  ;;  %v1689_v20 = vpack.c.bf16 %v32_v17, %v31_v16  ;;  %v33_v21 = vld [vmem:[#allocation2 + $0x40] sm:$0xff]  ;;  %s1892_s0 = smov 11   ;;  %s1898_s14 = smov 124   ;;  %vm455_vm15 = vcmask 130048  }
  0x18   :  { %85 = vperm.xlu1 %1753, %v68_v3   ;;  %79 = vperm.xlu0 %1752, %v66_v4   ;;  %v34_v22 = vld [vmem:[#allocation2 + $0x48] sm:$0xff]  ;;  %v35_v24 = vld [vmem:[#allocation2 + $0x50] sm:$0xff]  ;;  %v36_v25 = vld [vmem:[#allocation2 + $0x58] sm:$0xff]  ;;  %s1899_s15 = smov 120   ;;  %s1900_s16 = smov 112  }
  0x19   :  { %1680 = vmatpush3.bf16.msra.mxu0 %v1677_v9  ;;  %v1693_v23 = vpack.c.bf16 %v34_v22, %v33_v21  ;;  %v1962_v26 = vld [vmem:[#allocation2 + $0xb0] sm:$0xff]  ;;  %v1964_v27 = vld [vmem:[#allocation2 + $0xa8] sm:$0xff]  ;;  %v1697_v28 = vpack.c.bf16 %v36_v25, %v35_v24  ;;  %v1968_v29 = vld [vmem:[#allocation2 + $0xc0] sm:$0xff]  ;;  %s1901_s17 = smov 104   ;;  %s1902_s18 = smov 107  }
  0x1a   :  { %1682 = vmatprep.subr.bf16.mxu0 %v1681_v10  ;;  %2652 = vst [vmem:[#allocation5_spill] sm:$0xff] %v1962_v26  ;;  %v1970_v30 = vld [vmem:[#allocation2 + $0xb8] sm:$0xff]  ;;  %v37_v31 = vld [vmem:[#allocation2 + $0x60] sm:$0xff]  ;;  %v1974_v32 = vld [vmem:[#allocation2 + $0xd0] sm:$0xff]  ;;  %s1904_s19 = smov 99   ;;  %s1905_s20 = smov 83  }
  0x1b   :  { %v1976_v33 = vld [vmem:[#allocation2 + $0xc8] sm:$0xff]  ;;  %v1980_v34 = vld [vmem:[#allocation2 + $0xe0] sm:$0xff]  ;;  %v1982_v35 = vld [vmem:[#allocation2 + $0xd8] sm:$0xff]  ;;  %s1906_s21 = smov 123   ;;  %s1907_s22 = smov 16  }
  0x1c   :  { %91 = vperm.xlu1 %1753, %v70_v13   ;;  %88 = vperm.xlu0 %1752, %v69_v14   ;;  %s1908_s23 = smov 86  }
  0x1d   :  { %1684 = vmatpush3.bf16.msra.mxu0 %v1681_v10 }
  0x1e   :  { %1686 = vmatprep.subr.bf16.mxu0 %v1685_v15 }
  0x20   :  { %97 = vperm.xlu1 %1753, %v72_v18   ;;  %94 = vperm.xlu0 %1752, %v71_v19  }
  0x21   :  { %1688 = vmatpush3.bf16.msra.mxu0 %v1685_v15 }
  0x22   :  { %1690 = vmatprep.subr.bf16.mxu0 %v1689_v20 }
  0x24   :  { %263 = vrot.lane.b32.xlu1 %v1962_v26, %s1892_s0  ;;  %261 = vrot.lane.b32.xlu0 %v1964_v27, %s1892_s0 }
  0x25   :  { %1692 = vmatpush3.bf16.msra.mxu0 %v1689_v20 }
  0x26   :  { %1694 = vmatprep.subr.bf16.mxu0 %v1693_v23 }
  0x28   :  { %267 = vrot.lane.b32.xlu1 %v1968_v29, %s1892_s0  ;;  %265 = vrot.lane.b32.xlu0 %v1970_v30, %s1892_s0 }
  0x29   :  { %1696 = vmatpush3.bf16.msra.mxu0 %v1693_v23 }
  0x2a   :  { %1698 = vmatprep.subr.bf16.mxu0 %v1697_v28 }
  0x2c   :  { %271 = vrot.lane.b32.xlu1 %v1974_v32, %s1892_s0  ;;  %269 = vrot.lane.b32.xlu0 %v1976_v33, %s1892_s0 }
  0x2d   :  { %1700 = vmatpush3.bf16.msra.mxu0 %v1697_v28 }
  0x2e   :  { %1611 = vmatprep.subr.mxu0 %v37_v31 }
  0x30   :  { %275 = vrot.lane.b32.xlu1 %v1980_v34, %s1892_s0  ;;  %273 = vrot.lane.b32.xlu0 %v1982_v35, %s1892_s0 }
  0x31   :  { %1612 = vmatpush3.msra.mxu0 %v37_v31 }
  0x93   :  { %v83_v38 = vpop.permute.xlu1 %82  ;;  %v77_v39 = vpop.permute.xlu0 %76 }
  0x94   :  { %vm99_vm1 = vcmp.eq.s32.totalorder %v77_v39, %v74_v37  ;;  %vm101_vm2 = vcmp.eq.s32.totalorder %v83_v38, %v74_v37 }
  0x95   :  { %v1495_v41 = vsel %vm99_vm1, 1.0, %v2645_v40  ;;  %v1497_v44 = vsel %vm101_vm2, 1.0, %v2645_v40  ;;  %vm1910_vm1 = vmmov 0   ;;  %vm1283_vm2 = vcmask 326656  }
  0x96   :  { %1613 = vmatprep.mubr.msk.f32.mxu0 %vm123_vm0, %v1495_v41 }
  0x97   :  { %v86_v42 = vpop.permute.xlu1 %85  ;;  %v80_v43 = vpop.permute.xlu0 %79 }
  0x98   :  { %vm100_vm3 = vcmp.eq.s32.totalorder %v80_v43, %v74_v37  ;;  %vm102_vm4 = vcmp.eq.s32.totalorder %v86_v42, %v74_v37 }
  0x99   :  { %v1496_v45 = vsel %vm100_vm3, 1.0, %v2645_v40  ;;  %v1498_v48 = vsel %vm102_vm4, 1.0, %v2645_v40  ;;  %vm1322_vm3 = vcmask 1042432   ;;  %vm1406_vm4 = vcmask 261120  }
  0x9a   :  { %1614 = vmatmul.mubr.msk.f32.vlgmr.msra.gmra.mrb[0].mxu0 %vm123_vm0, %v1496_v45 }
  0x9b   :  { %v92_v46 = vpop.permute.xlu1 %91  ;;  %v89_v47 = vpop.permute.xlu0 %88  ;;  %1616 = vmatprep.mubr.msk.f32.mxu0 %vm123_vm0, %v1497_v44 }
  0x9c   :  { %vm103_vm5 = vcmp.eq.s32.totalorder %v89_v47, %v74_v37  ;;  %vm104_vm6 = vcmp.eq.s32.totalorder %v92_v46, %v74_v37 }
  0x9d   :  { %v1499_v49 = vsel %vm103_vm5, 1.0, %v2645_v40  ;;  %v1500_v52 = vsel %vm104_vm6, 1.0, %v2645_v40  ;;  %vm1484_vm5 = vcmask 58368   ;;  %vm1488_vm6 = vcmask 1024  }
  0x9e   :  { %1617 = vmatmul.mubr.msk.f32.gmra.mrb[2].mxu0 %vm123_vm0, %v1498_v48 }
  0x9f   :  { %v98_v50 = vpop.permute.xlu1 %97  ;;  %v95_v51 = vpop.permute.xlu0 %94  ;;  %1619 = vmatprep.mubr.msk.f32.mxu0 %vm123_vm0, %v1499_v49 }
  0xa0   :  { %vm105_vm7 = vcmp.eq.s32.totalorder %v95_v51, %v74_v37  ;;  %vm106_vm8 = vcmp.eq.s32.totalorder %v98_v50, %v74_v37 }
  0xa1   :  { %v1501_v53 = vsel %vm105_vm7, 1.0, %v2645_v40  ;;  %v1502_v54 = vsel %vm106_vm8, 1.0, %v2645_v40 }
  0xa2   :  { %1620 = vmatmul.mubr.msk.f32.gmra.mrb[4].mxu0 %vm123_vm0, %v1500_v52 }
  0xa3   :  { %1622 = vmatprep.mubr.msk.f32.mxu0 %vm123_vm0, %v1501_v53  ;;  %v264_v55 = vpop.permute.xlu1 %263  ;;  %v262_v56 = vpop.permute.xlu0 %261 }
  0xa6   :  { %1623 = vmatmul.mubr.msk.f32.gmra.mrb[6].mxu0 %vm123_vm0, %v1502_v54  ;;  %vm1074_vm0 = vcmask 64512  }
  0xa7   :  { %v268_v57 = vpop.permute.xlu1 %267  ;;  %v266_v58 = vpop.permute.xlu0 %265 }
  0xab   :  { %v272_v11 = vpop.permute.xlu1 %271  ;;  %v270_v16 = vpop.permute.xlu0 %269 }
  0xaf   :  { %v276_v48 = vpop.permute.xlu1 %275  ;;  %v274_v53 = vpop.permute.xlu0 %273 }
 0x16d   :  { %v2002_v59 = vpop.f32.mrb[0].mxu0 }
 0x16e   :  { %v2004_v60 = vpop.f32.mrb[1].mxu0  ;;  %v286_v61 = vmul.f32 %v2002_v59, %v264_v55  ;;  %v574_v62 = vrot.slane %v2002_v59, 7  ;;  %v591_v63 = vrot.slane %v2002_v59, 1  ;;  %v610_v0 = vrot.slane %v2002_v59, 2 }
 0x16f   :  { %v285_v1 = vmul.f32 %v262_v56, %v2004_v60  ;;  %v573_v2 = vrot.slane %v2004_v60, 7  ;;  %v590_v3 = vrot.slane %v2004_v60, 1  ;;  %v609_v4 = vrot.slane %v2004_v60, 2 }
 0x170   :  { %v629_v5 = vrot.slane %v2002_v59, 3  ;;  %v628_v6 = vrot.slane %v2004_v60, 3  ;;  %v547_v7 = vrot.slane %v2004_v60, 6  ;;  %v548_v8 = vrot.slane %v2002_v59, 6 }
 0x171   :  { %v2018_v9 = vpop.f32.mrb[2].mxu0  ;;  %v1754_v10 = vpack.i.bf16 %v286_v61, %v285_v1  ;;  %v2023_v12 = vsel %vm572_vm9, %v573_v2, %v574_v62  ;;  %v2028_v13 = vsel %vm589_vm10, %v590_v3, %v591_v63  ;;  %v2033_v14 = vsel %vm608_vm11, %v609_v4, %v610_v0 }
 0x172   :  { %v2035_v15 = vpop.f32.mrb[3].mxu0  ;;  %v288_v17 = vmul.f32 %v2018_v9, %v268_v57  ;;  %v578_v18 = vrot.slane %v2018_v9, 7  ;;  %v595_v19 = vrot.slane %v2018_v9, 1  ;;  %v614_v20 = vrot.slane %v2018_v9, 2 }
 0x173   :  { %2653 = vst [vmem:[#allocation6_spill] sm:$0xff] %v2035_v15  ;;  %1755 = vrot.lane.b32.xlu0 %v1754_v10, %s1894_s10  ;;  %v287_v21 = vmul.f32 %v266_v58, %v2035_v15  ;;  %v576_v22 = vrot.slane %v2035_v15, 7  ;;  %v593_v23 = vrot.slane %v2035_v15, 1  ;;  %v612_v24 = vrot.slane %v2035_v15, 2 }
 0x174   :  { %v631_v25 = vrot.slane %v2035_v15, 3  ;;  %v633_v28 = vrot.slane %v2018_v9, 3  ;;  %v2051_v31 = vsel %vm627_vm12, %v628_v6, %v629_v5  ;;  %v2058_v36 = vsel %vm546_vm13, %v547_v7, %v548_v8 }
 0x175   :  { %v2060_v37 = vpop.f32.mrb[4].mxu0  ;;  %v1759_v38 = vpack.i.bf16 %v288_v17, %v287_v21  ;;  %v2063_v39 = vsel %vm572_vm9, %v574_v62, %v576_v22  ;;  %v2066_v41 = vsel %vm572_vm9, %v576_v22, %v578_v18  ;;  %v2069_v42 = vsel %vm589_vm10, %v593_v23, %v595_v19 }
 0x176   :  { %v2071_v43 = vpop.f32.mrb[5].mxu0  ;;  %v290_v44 = vmul.f32 %v2060_v37, %v272_v11  ;;  %v582_v45 = vrot.slane %v2060_v37, 7  ;;  %v599_v46 = vrot.slane %v2060_v37, 1  ;;  %v2077_v47 = vsel %vm589_vm10, %v591_v63, %v593_v23 }
 0x177   :  { %1760 = vrot.lane.b32.xlu1 %v1759_v38, %s1894_s10  ;;  %v289_v49 = vmul.f32 %v270_v16, %v2071_v43  ;;  %v580_v50 = vrot.slane %v2071_v43, 7  ;;  %v597_v51 = vrot.slane %v2071_v43, 1  ;;  %v2084_v52 = vsel %vm608_vm11, %v612_v24, %v614_v20 }
 0x178   :  { %v2087_v54 = vsel %vm608_vm11, %v610_v0, %v612_v24  ;;  %v616_v55 = vrot.slane %v2071_v43, 2  ;;  %v618_v56 = vrot.slane %v2060_v37, 2  ;;  %v2092_v57 = vsel %vm627_vm12, %v629_v5, %v631_v25 }
 0x179   :  { %v2094_v58 = vpop.f32.mrb[6].mxu0  ;;  %v1764_v61 = vpack.i.bf16 %v290_v44, %v289_v49  ;;  %v581_v62 = vsel %vm572_vm9, %v578_v18, %v580_v50  ;;  %v583_v63 = vsel %vm572_vm9, %v580_v50, %v582_v45  ;;  %v2099_v1 = vsel %vm589_vm10, %v597_v51, %v599_v46 }
 0x17a   :  { %2654 = vst [vmem:[#allocation7_spill] sm:$0xff] %v2094_v58  ;;  %v2101_v10 = vpop.f32.mrb[7].mxu0  ;;  %v292_v0 = vmul.f32 %v2094_v58, %v276_v48  ;;  %v2105_v11 = vsel %vm589_vm10, %v595_v19, %v597_v51  ;;  %v2108_v5 = vsel %vm608_vm11, %v616_v55, %v618_v56  ;;  %v2111_v16 = vsel %vm608_vm11, %v614_v20, %v616_v55 }
 0x17b   :  { %2655 = vst [vmem:[#allocation8_spill] sm:$0xff] %v2101_v10  ;;  %1765 = vrot.lane.b32.xlu0 %v1764_v61, %s1894_s10  ;;  %v291_v17 = vmul.f32 %v274_v53, %v2101_v10  ;;  %v635_v18 = vrot.slane %v2071_v43, 3  ;;  %v570_v21 = vrot.slane %v2094_v58, 7  ;;  %v2118_v22 = vsel %vm627_vm12, %v631_v25, %v633_v28 }
 0x17c   :  { %v603_v19 = vrot.slane %v2094_v58, 1  ;;  %v637_v23 = vrot.slane %v2060_v37, 3  ;;  %v622_v24 = vrot.slane %v2094_v58, 2  ;;  %v584_v20 = vrot.slane %v2101_v10, 7 }
 0x17d   :  { %v1769_v38 = vpack.i.bf16 %v292_v0, %v291_v17  ;;  %v2125_v44 = vsel %vm627_vm12, %v633_v28, %v635_v18  ;;  %v2130_v48 = vsel %vm572_vm9, %v570_v21, %v573_v2  ;;  %v601_v25 = vrot.slane %v2101_v10, 1 }
 0x17e   :  { %v2136_v49 = vsel %vm589_vm10, %v603_v19, %v590_v3  ;;  %v2139_v50 = vsel %vm627_vm12, %v635_v18, %v637_v23  ;;  %v2144_v28 = vsel %vm608_vm11, %v622_v24, %v609_v4  ;;  %v2147_v51 = vsel %vm572_vm9, %v582_v45, %v584_v20 }
 0x17f   :  { %649 = vrot.lane.b32.xlu0 %v2023_v12, %s1895_s11  ;;  %1770 = vrot.lane.b32.xlu1 %v1769_v38, %s1894_s10  ;;  %v2153_v2 = vsel %vm589_vm10, %v601_v25, %v603_v19  ;;  %v620_v3 = vrot.slane %v2101_v10, 2  ;;  %v641_v53 = vrot.slane %v2094_v58, 3  ;;  %v2158_v55 = vsel %vm572_vm9, %v584_v20, %v570_v21  ;;  %v38_v21 = vld [vmem:[#allocation2 + $0x68] sm:$0xff] }
 0x180   :  { %v2161_v4 = vsel %vm589_vm10, %v599_v46, %v601_v25  ;;  %v639_v45 = vrot.slane %v2101_v10, 3  ;;  %v552_v61 = vrot.slane %v2018_v9, 6  ;;  %v554_v12 = vrot.slane %v2071_v43, 6  ;;  %1641 = vmatprep.mubr.msk.f32.mxu1 %vm325_vm14, %v38_v21 }
 0x181   :  { %v2167_v0 = vsel %vm608_vm11, %v620_v3, %v622_v24  ;;  %v2172_v17 = vsel %vm627_vm12, %v641_v53, %v628_v6  ;;  %v2175_v18 = vsel %vm608_vm11, %v618_v56, %v620_v3  ;;  %v550_v46 = vrot.slane %v2035_v15, 6 }
 0x182   :  { %v2179_v19 = vsel %vm627_vm12, %v639_v45, %v641_v53  ;;  %v2182_v20 = vsel %vm627_vm12, %v637_v23, %v639_v45  ;;  %v2185_v24 = vsel %vm546_vm13, %v552_v61, %v554_v12  ;;  %v556_v23 = vrot.slane %v2060_v37, 6  ;;  %v41_v53 = vld [vmem:[#allocation2 + $0x80] sm:$0xff] }
 0x183   :  { %655 = vrot.lane.b32.xlu0 %v581_v62, %s1895_s11  ;;  %651 = vrot.lane.b32.xlu1 %v2063_v39, %s1895_s11  ;;  %v2193_v6 = vsel %vm546_vm13, %v548_v8, %v550_v46  ;;  %v2196_v56 = vsel %vm546_vm13, %v550_v46, %v552_v61  ;;  %v537_v38 = vrot.slane %v2094_v58, 6  ;;  %v558_v25 = vrot.slane %v2101_v10, 6  ;;  %v43_v61 = vld [vmem:[#allocation2 + $0x90] sm:$0xff] }
 0x184   :  { %v2203_v62 = vsel %vm546_vm13, %v554_v12, %v556_v23  ;;  %v44_v12 = vld [vmem:[#allocation2 + $0x98] sm:$0xff] }
 0x185   :  { %v2208_v39 = vsel %vm546_vm13, %v537_v38, %v547_v7  ;;  %v2211_v8 = vsel %vm546_vm13, %v556_v23, %v558_v25  ;;  %v2214_v3 = vsel %vm546_vm13, %v558_v25, %v537_v38 }
 0x187   :  { %679 = vrot.lane.b32.xlu0 %v2004_v60, %s1896_s12  ;;  %653 = vrot.lane.b32.xlu1 %v2066_v41, %s1895_s11 }
 0x18b   :  { %683 = vrot.lane.b32.xlu0 %v2035_v15, %s1896_s12  ;;  %657 = vrot.lane.b32.xlu1 %v583_v63, %s1895_s11 }
 0x18f   :  { %687 = vrot.lane.b32.xlu0 %v2071_v43, %s1896_s12  ;;  %681 = vrot.lane.b32.xlu1 %v2002_v59, %s1896_s12 }
 0x193   :  { %691 = vrot.lane.b32.xlu0 %v2101_v10, %s1896_s12  ;;  %685 = vrot.lane.b32.xlu1 %v2018_v9, %s1896_s12 }
 0x197   :  { %712 = vrot.lane.b32.xlu0 %v2028_v13, %s1897_s13  ;;  %689 = vrot.lane.b32.xlu1 %v2060_v37, %s1896_s12 }
 0x19b   :  { %716 = vrot.lane.b32.xlu0 %v2069_v42, %s1897_s13  ;;  %693 = vrot.lane.b32.xlu1 %v2094_v58, %s1896_s12 }
 0x19f   :  { %720 = vrot.lane.b32.xlu0 %v2099_v1, %s1897_s13  ;;  %714 = vrot.lane.b32.xlu1 %v2077_v47, %s1897_s13 }
 0x1a3   :  { %745 = vrot.lane.b32.xlu0 %v2033_v14, %s1898_s14  ;;  %718 = vrot.lane.b32.xlu1 %v2105_v11, %s1897_s13 }
 0x1a7   :  { %749 = vrot.lane.b32.xlu0 %v2084_v52, %s1898_s14  ;;  %747 = vrot.lane.b32.xlu1 %v2087_v54, %s1898_s14 }
 0x1ab   :  { %753 = vrot.lane.b32.xlu0 %v2108_v5, %s1898_s14  ;;  %751 = vrot.lane.b32.xlu1 %v2111_v16, %s1898_s14 }
 0x1af   :  { %833 = vrot.lane.b32.xlu0 %v2028_v13, %s1899_s15  ;;  %835 = vrot.lane.b32.xlu1 %v2077_v47, %s1899_s15 }
 0x1b3   :  { %837 = vrot.lane.b32.xlu0 %v2069_v42, %s1899_s15  ;;  %839 = vrot.lane.b32.xlu1 %v2105_v11, %s1899_s15 }
 0x1b7   :  { %841 = vrot.lane.b32.xlu0 %v2099_v1, %s1899_s15  ;;  %867 = vrot.lane.b32.xlu1 %v2087_v54, %s1900_s16 }
 0x1bb   :  { %865 = vrot.lane.b32.xlu0 %v2033_v14, %s1900_s16  ;;  %871 = vrot.lane.b32.xlu1 %v2111_v16, %s1900_s16 }
 0x1bf   :  { %869 = vrot.lane.b32.xlu0 %v2084_v52, %s1900_s16  ;;  %900 = vrot.lane.b32.xlu1 %v2092_v57, %s1901_s17 }
 0x1c3   :  { %873 = vrot.lane.b32.xlu0 %v2108_v5, %s1900_s16  ;;  %904 = vrot.lane.b32.xlu1 %v2125_v44, %s1901_s17 }
 0x1c7   :  { %898 = vrot.lane.b32.xlu0 %v2051_v31, %s1901_s17  ;;  %647 = vrot.lane.b32.xlu1 %v2130_v48, %s1895_s11 }
 0x1cb   :  { %902 = vrot.lane.b32.xlu0 %v2118_v22, %s1901_s17  ;;  %726 = vrot.lane.b32.xlu1 %v2136_v49, %s1897_s13 }
 0x1cf   :  { %906 = vrot.lane.b32.xlu0 %v2139_v50, %s1901_s17  ;;  %759 = vrot.lane.b32.xlu1 %v2144_v28, %s1898_s14  ;;  %v39_v50 = vld [vmem:[#allocation2 + $0x70] sm:$0xff] }
 0x1d3   :  { %659 = vrot.lane.b32.xlu0 %v2147_v51, %s1895_s11  ;;  %847 = vrot.lane.b32.xlu1 %v2136_v49, %s1899_s15 }
 0x1d7   :  { %724 = vrot.lane.b32.xlu0 %v2153_v2, %s1897_s13  ;;  %879 = vrot.lane.b32.xlu1 %v2144_v28, %s1900_s16  ;;  %v40_v28 = vld [vmem:[#allocation2 + $0x78] sm:$0xff] }
 0x1db   :  { %757 = vrot.lane.b32.xlu0 %v2167_v0, %s1898_s14  ;;  %912 = vrot.lane.b32.xlu1 %v2172_v17, %s1901_s17 }
 0x1df   :  { %845 = vrot.lane.b32.xlu0 %v2153_v2, %s1899_s15  ;;  %661 = vrot.lane.b32.xlu1 %v2158_v55, %s1895_s11  ;;  %v42_v55 = vld [vmem:[#allocation2 + $0x88] sm:$0xff] }
 0x1e3   :  { %877 = vrot.lane.b32.xlu0 %v2167_v0, %s1900_s16  ;;  %722 = vrot.lane.b32.xlu1 %v2161_v4, %s1897_s13 }
 0x1e5   :  { %v1756_v7 = vpop.permute.xlu0 %1755 }
 0x1e6   :  { %v1758_v13 = vunpack.i.h.bf16 %v1756_v7  ;;  %v1757_v14 = vunpack.i.l.bf16 %v1756_v7 }
 0x1e7   :  { %910 = vrot.lane.b32.xlu0 %v2179_v19, %s1901_s17  ;;  %755 = vrot.lane.b32.xlu1 %v2175_v18, %s1898_s14 }
 0x1e8   :  { %v1701_v31 = vpack.c.bf16 %v1758_v13, %v1757_v14 }
 0x1e9   :  { %v1761_v41 = vpop.permute.xlu1 %1760 }
 0x1ea   :  { %v1763_v42 = vunpack.i.h.bf16 %v1761_v41  ;;  %v1762_v47 = vunpack.i.l.bf16 %v1761_v41  ;;  %1702 = vmatprep.subr.bf16.mxu1 %v1701_v31 }
 0x1eb   :  { %1704 = vmatpush3.bf16.msra.mxu1 %v1701_v31  ;;  %843 = vrot.lane.b32.xlu1 %v2161_v4, %s1899_s15 }
 0x1ec   :  { %v1705_v52 = vpack.c.bf16 %v1763_v42, %v1762_v47 }
 0x1ed   :  { %v1766_v54 = vpop.permute.xlu0 %1765 }
 0x1ee   :  { %v1768_v57 = vunpack.i.h.bf16 %v1766_v54  ;;  %v1767_v63 = vunpack.i.l.bf16 %v1766_v54  ;;  %1706 = vmatprep.subr.bf16.mxu1 %v1705_v52 }
 0x1ef   :  { %1708 = vmatpush3.bf16.msra.mxu1 %v1705_v52  ;;  %875 = vrot.lane.b32.xlu1 %v2175_v18, %s1900_s16  ;;  %v45_v18 = vld [vmem:[#allocation2 + $0xa0] sm:$0xff] }
 0x1f0   :  { %v1709_v1 = vpack.c.bf16 %v1768_v57, %v1767_v63 }
 0x1f1   :  { %v650_v11 = vpop.permute.xlu0 %649  ;;  %v1771_v5 = vpop.permute.xlu1 %1770 }
 0x1f2   :  { %v1773_v16 = vunpack.i.h.bf16 %v1771_v5  ;;  %v1772_v22 = vunpack.i.l.bf16 %v1771_v5  ;;  %1710 = vmatprep.subr.bf16.mxu1 %v1709_v1  ;;  %v672_v13 = vadd.f32 %v650_v11, %v2058_v36 }
 0x1f3   :  { %1712 = vmatpush3.bf16.msra.mxu1 %v1709_v1  ;;  %908 = vrot.lane.b32.xlu1 %v2182_v20, %s1901_s17 }
 0x1f4   :  { %v1713_v44 = vpack.c.bf16 %v1773_v16, %v1772_v22 }
 0x1f5   :  { %v2321_v48 = vpop.permute.xlu0 %655  ;;  %v2323_v49 = vpop.permute.xlu1 %651 }
 0x1f6   :  { %1714 = vmatprep.subr.bf16.mxu1 %v1713_v44 }
 0x1f7   :  { %1716 = vmatpush3.bf16.msra.mxu1 %v1713_v44 }
 0x1f9   :  { %v2325_v51 = vpop.permute.xlu0 %679  ;;  %v2327_v2 = vpop.permute.xlu1 %653 }
 0x1fa   :  { %1642 = vmatmul.mubr.msk.f32.vlgmr.msra.gmra.mrb[0].mxu1 %vm325_vm14, %v39_v50 }
 0x1fb   :  { %1644 = vmatprep.mubr.msk.f32.mxu1 %vm325_vm14, %v40_v28 }
 0x1fd   :  { %v2331_v4 = vpop.permute.xlu0 %683  ;;  %v2333_v45 = vpop.permute.xlu1 %657 }
 0x1fe   :  { %1645 = vmatmul.mubr.msk.f32.gmra.mrb[2].mxu1 %vm325_vm14, %v41_v53 }
 0x1ff   :  { %1647 = vmatprep.mubr.msk.f32.mxu1 %vm325_vm14, %v42_v55 }
 0x201   :  { %v2337_v0 = vpop.permute.xlu0 %687  ;;  %v682_v17 = vpop.permute.xlu1 %681 }
 0x202   :  { %1648 = vmatmul.mubr.msk.f32.gmra.mrb[4].mxu1 %vm325_vm14, %v43_v61  ;;  %v704_v41 = vadd.f32 %v682_v17, %v672_v13 }
 0x203   :  { %1650 = vmatprep.mubr.msk.f32.mxu1 %vm325_vm14, %v44_v12 }
 0x205   :  { %v2341_v46 = vpop.permute.xlu0 %691  ;;  %v2343_v21 = vpop.permute.xlu1 %685 }
 0x206   :  { %1651 = vmatmul.mubr.msk.f32.gmra.mrb[6].mxu1 %vm325_vm14, %v45_v18 }
 0x209   :  { %v713_v19 = vpop.permute.xlu0 %712  ;;  %v2346_v20 = vpop.permute.xlu1 %689 }
 0x20d   :  { %v2348_v23 = vpop.permute.xlu0 %716  ;;  %v2350_v38 = vpop.permute.xlu1 %693 }
 0x211   :  { %v2352_v25 = vpop.permute.xlu0 %720  ;;  %v715_v7 = vpop.permute.xlu1 %714 }
 0x212   :  { %v737_v42 = vadd.f32 %v715_v7, %v704_v41 }
 0x215   :  { %v746_v14 = vpop.permute.xlu0 %745  ;;  %v719_v31 = vpop.permute.xlu1 %718 }
 0x219   :  { %v2355_v47 = vpop.permute.xlu0 %749  ;;  %v748_v52 = vpop.permute.xlu1 %747 }
 0x21a   :  { %v770_v54 = vadd.f32 %v748_v52, %v737_v42 }
 0x21c   :  { %v778_v57 = vadd.f32 %v770_v54, %v1962_v26 }
 0x21d   :  { %v2358_v63 = vpop.permute.xlu0 %753  ;;  %v752_v1 = vpop.permute.xlu1 %751 }
 0x21e   :  { %v1528_v5 = vmul.f32 -1.442695, %v778_v57 }
 0x220   :  { %1776 = vpow2.f32 %v1528_v5 }
 0x221   :  { %v834_v16 = vpop.permute.xlu0 %833  ;;  %v2360_v22 = vpop.permute.xlu1 %835 }
 0x222   :  { %v2377_v13 = vadd.f32 %v834_v16, %v2004_v60 }
 0x225   :  { %v838_v44 = vpop.permute.xlu0 %837  ;;  %v2362_v36 = vpop.permute.xlu1 %839 }
 0x226   :  { %v2383_v57 = vadd.f32 %v838_v44, %v2035_v15 }
 0x229   :  { %v2364_v11 = vpop.permute.xlu0 %841  ;;  %v2366_v50 = vpop.permute.xlu1 %867 }
 0x22a   :  { %v1777_v28 = vpop.eup %1776 }
 0x22b   :  { %v810_v53 = vadd.f32 1.0, %v1777_v28 }
 0x22d   :  { %v866_v55 = vpop.permute.xlu0 %865  ;;  %v2368_v61 = vpop.permute.xlu1 %871  ;;  %1778 = vrcp.f32 %v810_v53 }
 0x22e   :  { %v2380_v42 = vadd.f32 %v866_v55, %v2377_v13 }
 0x231   :  { %v870_v12 = vpop.permute.xlu0 %869  ;;  %v2370_v17 = vpop.permute.xlu1 %900 }
 0x232   :  { %v2390_v53 = vadd.f32 %v870_v12, %v2383_v57 }
 0x235   :  { %v2372_v18 = vpop.permute.xlu0 %873  ;;  %v2374_v7 = vpop.permute.xlu1 %904 }
 0x237   :  { %v1779_v41 = vpop.eup %1778 }
 0x238   :  { %937 = vperm.xlu1 %1753, %v1779_v41  }
 0x239   :  { %v899_v52 = vpop.permute.xlu0 %898  ;;  %v648_v54 = vpop.permute.xlu1 %647 }
 0x23a   :  { %v2386_v5 = vadd.f32 %v899_v52, %v2380_v42  ;;  %v671_v28 = vadd.f32 %v648_v54, %v2208_v39 }
 0x23c   :  { %2656 = vst [vmem:[#allocation9_spill] sm:$0xff] %v2386_v5  ;;  %v703_v16 = vadd.f32 %v2325_v51, %v671_v28 }
 0x23d   :  { %v903_v40 = vpop.permute.xlu0 %902  ;;  %v2393_v26 = vpop.permute.xlu1 %726 }
 0x23e   :  { %v736_v55 = vadd.f32 %v713_v19, %v703_v16  ;;  %v2396_v41 = vadd.f32 %v903_v40, %v2390_v53 }
 0x240   :  { %v769_v10 = vadd.f32 %v746_v14, %v736_v55 }
 0x241   :  { %v2398_v44 = vpop.permute.xlu1 %759  ;;  %v2407_v14 = vpop.permute.xlu0 %906 }
 0x242   :  { %v777_v52 = vadd.f32 %v769_v10, %v1964_v27  ;;  %2657 = vst [vmem:[#allocation10_spill] sm:$0xff] %v2407_v14  ;;  %v674_v10 = vadd.f32 %v2327_v2, %v2196_v56  ;;  %v676_v2 = vadd.f32 %v2333_v45, %v2203_v62 }
 0x244   :  { %v1527_v15 = vmul.f32 -1.442695, %v777_v52 }
 0x245   :  { %v848_v5 = vpop.permute.xlu1 %847  ;;  %v660_v28 = vpop.permute.xlu0 %659 }
 0x246   :  { %1780 = vpow2.f32 %v1527_v15  ;;  %v2402_v39 = vadd.f32 %v2094_v58, %v848_v5  ;;  %v706_v15 = vadd.f32 %v2343_v21, %v674_v10 }
 0x248   :  { %v739_v5 = vadd.f32 %v719_v31, %v706_v15  ;;  %v677_v31 = vadd.f32 %v660_v28, %v2211_v8  ;;  %v708_v15 = vadd.f32 %v2346_v20, %v676_v2 }
 0x249   :  { %v880_v12 = vpop.permute.xlu1 %879  ;;  %v725_v52 = vpop.permute.xlu0 %724 }
 0x24a   :  { %v2405_v51 = vadd.f32 %v880_v12, %v2402_v39  ;;  %v772_v55 = vadd.f32 %v752_v1, %v739_v5  ;;  %v709_v62 = vadd.f32 %v2341_v46, %v677_v31 }
 0x24d   :  { %v2412_v16 = vpop.permute.xlu1 %912 }
 0x250   :  { %v1781_v54 = vpop.eup %1780 }
 0x251   :  { %v809_v19 = vadd.f32 1.0, %v1781_v54  ;;  %v2414_v12 = vpop.permute.xlu1 %661  ;;  %v780_v54 = vadd.f32 %v772_v55, %v1968_v29 }
 0x253   :  { %1782 = vrcp.f32 %v809_v19  ;;  %v758_v19 = vpop.permute.xlu0 %757  ;;  %v1530_v58 = vmul.f32 -1.442695, %v780_v54 }
 0x255   :  { %v723_v14 = vpop.permute.xlu1 %722  ;;  %1784 = vpow2.f32 %v1530_v58 }
 0x256   :  { %v741_v45 = vadd.f32 %v723_v14, %v708_v15 }
 0x257   :  { %v2424_v1 = vpop.permute.xlu0 %845 }
 0x25b   :  { %v2433_v54 = vpop.permute.xlu0 %877 }
 0x25d   :  { %v1783_v40 = vpop.eup %1782 }
 0x25e   :  { %932 = vperm.xlu0 %1752, %v1783_v40   ;;  %v673_v40 = vadd.f32 %v2323_v49, %v2193_v6 }
 0x25f   :  { %v2438_v15 = vpop.permute.xlu0 %910 }
 0x260   :  { %v705_v56 = vadd.f32 %v2331_v4, %v673_v40  ;;  %v756_v4 = vpop.permute.xlu1 %755 }
 0x262   :  { %v738_v21 = vadd.f32 %v2348_v23, %v705_v56  ;;  %v774_v23 = vadd.f32 %v756_v4, %v741_v45  ;;  %v1785_v56 = vpop.eup %1784 }
 0x264   :  { %v771_v6 = vadd.f32 %v2355_v47, %v738_v21  ;;  %v742_v47 = vadd.f32 %v725_v52, %v709_v62 }
 0x266   :  { %v779_v8 = vadd.f32 %v771_v6, %v1970_v30  ;;  %v775_v21 = vadd.f32 %v758_v19, %v742_v47  ;;  %v812_v30 = vadd.f32 1.0, %v1785_v56 }
 0x268   :  { %v1529_v2 = vmul.f32 -1.442695, %v779_v8  ;;  %v783_v52 = vadd.f32 %v775_v21, %v1982_v35 }
 0x26a   :  { %1786 = vpow2.f32 %v1529_v2 }
 0x26b   :  { %1788 = vrcp.f32 %v812_v30 }
 0x274   :  { %v1787_v45 = vpop.eup %1786 }
 0x275   :  { %v811_v8 = vadd.f32 1.0, %v1787_v45 }
 0x2cd   :  { %v1643_v10 = vpop.f32.mrb[0].mxu1 }
 0x2ce   :  { %v416_v49 = vpop.f32.mrb[1].mxu1  ;;  %v459_v5 = vsel %vm455_vm15, %v1643_v10, 0.0  ;;  %v782_v10 = vadd.f32 %v774_v23, %v1974_v32 }
 0x2cf   :  { %460 = vadd.xlane.f32.xlu1 %v459_v5  ;;  %v456_v55 = vsel %vm455_vm15, %v416_v49, 0.0 }
 0x2d0   :  { %457 = vadd.xlane.f32.xlu0 %v456_v55  ;;  %v1532_v49 = vmul.f32 -1.442695, %v782_v10  ;;  %v1533_v55 = vmul.f32 -1.442695, %v783_v52 }
 0x2d1   :  { %v1646_v58 = vpop.f32.mrb[2].mxu1 }
 0x2d2   :  { %v426_v28 = vpop.f32.mrb[3].mxu1  ;;  %v465_v20 = vsel %vm455_vm15, %v1646_v58, 0.0  ;;  %1790 = vpow2.f32 %v1532_v49  ;;  %v1789_v58 = vpop.eup %1788 }
 0x2d3   :  { %v462_v14 = vsel %vm455_vm15, %v426_v28, 0.0  ;;  %1792 = vpow2.f32 %v1533_v55  ;;  %v2660_v55 = vld [vmem:[#allocation5_spill] sm:$0xff] }
 0x2d4   :  { %466 = vadd.xlane.f32.xlu0 %v465_v20  ;;  %1794 = vrcp.f32 %v811_v8  ;;  %v678_v20 = vadd.f32 %v2414_v12, %v2214_v3 }
 0x2d5   :  { %v1649_v40 = vpop.f32.mrb[4].mxu1 }
 0x2d6   :  { %v436_v46 = vpop.f32.mrb[5].mxu1  ;;  %v471_v19 = vsel %vm455_vm15, %v1649_v40, 0.0  ;;  %v675_v40 = vadd.f32 %v2321_v48, %v2185_v24  ;;  %v710_v56 = vadd.f32 %v2350_v38, %v678_v20  ;;  %v858_v38 = vadd.f32 %v2002_v59, %v2360_v22 }
 0x2d7   :  { %v468_v31 = vsel %vm455_vm15, %v436_v46, 0.0 }
 0x2d8   :  { %463 = vadd.xlane.f32.xlu0 %v462_v14  ;;  %469 = vadd.xlane.f32.xlu1 %v468_v31  ;;  %v743_v46 = vadd.f32 %v2393_v26, %v710_v56  ;;  %v1903_v26 = vmov 1  }
 0x2d9   :  { %v1652_v6 = vpop.f32.mrb[6].mxu1 }
 0x2da   :  { %v446_v5 = vpop.f32.mrb[7].mxu1  ;;  %v477_v4 = vsel %vm455_vm15, %v1652_v6, 0.0  ;;  %v776_v12 = vadd.f32 %v2398_v44, %v743_v46  ;;  %v890_v44 = vadd.f32 %v2366_v50, %v858_v38 }
 0x2db   :  { %v474_v30 = vsel %vm455_vm15, %v446_v5, 0.0 }
 0x2dc   :  { %472 = vadd.xlane.f32.xlu0 %v471_v19  ;;  %v1791_v35 = vpop.eup %1790 }
 0x2dd   :  { %v933_v32 = vpop.permute.xlu0 %932  ;;  %v814_v23 = vadd.f32 1.0, %v1791_v35  ;;  %v1793_v28 = vpop.eup %1792 }
 0x2de   :  { %v2444_v62 = vmul.f32 %v933_v32, %v2004_v60  ;;  %v815_v47 = vadd.f32 1.0, %v1793_v28  ;;  %v707_v60 = vadd.f32 %v2337_v0, %v675_v40  ;;  %v1795_v21 = vpop.eup %1794  ;;  %v784_v0 = vadd.f32 %v776_v12, %v1980_v34  ;;  %v844_v34 = vpop.permute.xlu1 %843 }
 0x2df   :  { %1796 = vrcp.f32 %v814_v23 }
 0x2e0   :  { %478 = vadd.xlane.f32.xlu0 %v477_v4  ;;  %1798 = vrcp.f32 %v815_v47  ;;  %v740_v2 = vadd.f32 %v2352_v25, %v707_v60  ;;  %v1534_v25 = vmul.f32 -1.442695, %v784_v0  ;;  %v2516_v47 = vld [vmem:[#allocation2 + $0xb8] sm:$0xff] }
 0x2e2   :  { %v773_v10 = vadd.f32 %v2358_v63, %v740_v2  ;;  %v860_v63 = vadd.f32 %v2018_v9, %v2362_v36  ;;  %v862_v36 = vadd.f32 %v2060_v37, %v844_v34  ;;  %v876_v49 = vpop.permute.xlu1 %875 }
 0x2e4   :  { %v781_v3 = vadd.f32 %v773_v10, %v1976_v33  ;;  %v892_v31 = vadd.f32 %v2368_v61, %v860_v63  ;;  %v2471_v19 = vadd.f32 %v876_v49, %v862_v36  ;;  %v923_v61 = vadd.f32 %v2370_v17, %v890_v44 }
 0x2e5   :  { %v861_v17 = vadd.f32 %v2364_v11, %v2071_v43 }
 0x2e6   :  { %v1531_v48 = vmul.f32 -1.442695, %v781_v3  ;;  %v925_v5 = vadd.f32 %v2374_v7, %v892_v31 }
 0x2e7   :  { %v2495_v7 = vadd.f32 %v2372_v18, %v861_v17  ;;  %v909_v18 = vpop.permute.xlu1 %908 }
 0x2e8   :  { %1800 = vpow2.f32 %v1531_v48  ;;  %v2523_v48 = vld [vmem:[#allocation2 + $0xe0] sm:$0xff] }
 0x2e9   :  { %947 = vperm.xlu1 %1753, %v1789_v58   ;;  %v1797_v14 = vpop.eup %1796  ;;  %1802 = vpow2.f32 %v1534_v25 }
 0x2ea   :  { %v1799_v24 = vpop.eup %1798 }
 0x2f2   :  { %v1801_v22 = vpop.eup %1800 }
 0x2f3   :  { %v813_v6 = vadd.f32 1.0, %v1801_v22  ;;  %v1803_v52 = vpop.eup %1802 }
 0x2f4   :  { %v816_v50 = vadd.f32 1.0, %v1803_v52 }
 0x2f5   :  { %1804 = vrcp.f32 %v813_v6 }
 0x2f6   :  { %942 = vperm.xlu0 %1752, %v1795_v21   ;;  %1806 = vrcp.f32 %v816_v50  ;;  %v2520_v21 = vld [vmem:[#allocation2 + $0xd0] sm:$0xff]  ;;  %v927_v50 = vadd.f32 %v909_v18, %v2471_v19 }
 0x2fa   :  { %957 = vperm.xlu0 %1752, %v1797_v14  }
 0x2fe   :  { %962 = vperm.xlu0 %1752, %v1799_v24  }
 0x2ff   :  { %v1805_v32 = vpop.eup %1804 }
 0x300   :  { %v1807_v4 = vpop.eup %1806 }
 0x302   :  { %988 = vrot.lane.b32.xlu0 %v858_v38, %s1902_s18 }
 0x303   :  { %1775 = vset.pattern.permute.xlu0 %v1903_v26 }
 0x306   :  { %992 = vrot.lane.b32.xlu0 %v860_v63, %s1902_s18 }
 0x30a   :  { %1020 = vrot.lane.b32.xlu0 %v890_v44, %s1904_s19 }
 0x30d   :  { %475 = vadd.xlane.f32.xlu1 %v474_v30 }
 0x30e   :  { %1024 = vrot.lane.b32.xlu0 %v892_v31, %s1904_s19 }
 0x312   :  { %996 = vrot.lane.b32.xlu0 %v862_v36, %s1902_s18 }
 0x316   :  { %1028 = vrot.lane.b32.xlu0 %v2471_v19, %s1904_s19 }
 0x31a   :  { %1052 = vrot.lane.b32.xlu0 %v923_v61, %s1905_s20 }
 0x31e   :  { %1056 = vrot.lane.b32.xlu0 %v925_v5, %s1905_s20  ;;  %952 = vperm.xlu1 %1753, %v1805_v32  }
 0x322   :  { %1000 = vrot.lane.b32.xlu0 %v2402_v39, %s1902_s18  ;;  %967 = vperm.xlu1 %1753, %v1807_v4  }
 0x326   :  { %1032 = vrot.lane.b32.xlu0 %v2405_v51, %s1904_s19  ;;  %986 = vrot.lane.b32.xlu1 %v2377_v13, %s1902_s18  ;;  %v2658_v13 = vld [vmem:[#allocation9_spill] sm:$0xff] }
 0x327   :  { %1774 = vset.pattern.permute.xlu1 %v1903_v26 }
 0x32a   :  { %990 = vrot.lane.b32.xlu1 %v2383_v57, %s1902_s18 }
 0x32e   :  { %1018 = vrot.lane.b32.xlu1 %v2380_v42, %s1904_s19  ;;  %v2659_v42 = vld [vmem:[#allocation8_spill] sm:$0xff] }
 0x32f   :  { %v863_v57 = vadd.f32 %v2424_v1, %v2659_v42 }
 0x331   :  { %v2507_v11 = vadd.f32 %v2433_v54, %v863_v57 }
 0x332   :  { %1022 = vrot.lane.b32.xlu1 %v2390_v53, %s1904_s19  ;;  %v2511_v53 = vpop.permute.xlu1 %937 }
 0x333   :  { %v928_v19 = vadd.f32 %v2438_v15, %v2507_v11 }
 0x336   :  { %994 = vrot.lane.b32.xlu1 %v861_v17, %s1902_s18  ;;  %v2661_v17 = vld [vmem:[#allocation10_spill] sm:$0xff] }
 0x33a   :  { %1026 = vrot.lane.b32.xlu1 %v2495_v7, %s1904_s19 }
 0x33e   :  { %1050 = vrot.lane.b32.xlu1 %v2658_v13, %s1905_s20  ;;  %v926_v13 = vadd.f32 %v2661_v17, %v2495_v7  ;;  %v2662_v7 = vld [vmem:[#allocation6_spill] sm:$0xff] }
 0x342   :  { %1054 = vrot.lane.b32.xlu1 %v2396_v41, %s1905_s20 }
 0x346   :  { %998 = vrot.lane.b32.xlu1 %v863_v57, %s1902_s18 }
 0x34a   :  { %1030 = vrot.lane.b32.xlu1 %v2507_v11, %s1904_s19 }
 0x35c   :  { %v461_v39 = vpop.xlane.xlu1 %460 }
 0x35d   :  { %v481_v45 = vadd.f32 %v461_v39, %v2660_v55  ;;  %v458_v58 = vpop.xlane.xlu0 %457  ;;  %v2534_v55 = vld [vmem:[#allocation2 + $0xd8] sm:$0xff] }
 0x35e   :  { %v480_v41 = vadd.f32 %v458_v58, %v1964_v27 }
 0x35f   :  { %v1520_v8 = vmul.f32 -1.442695, %v481_v45 }
 0x360   :  { %v1519_v35 = vmul.f32 -1.442695, %v480_v41 }
 0x361   :  { %1808 = vpow2.f32 %v1520_v8  ;;  %v467_v1 = vpop.xlane.xlu0 %466 }
 0x362   :  { %1810 = vpow2.f32 %v1519_v35  ;;  %v483_v54 = vadd.f32 %v467_v1, %v1968_v29 }
 0x364   :  { %v1522_v23 = vmul.f32 -1.442695, %v483_v54  ;;  %v2543_v54 = vld [vmem:[#allocation2 + $0xa8] sm:$0xff] }
 0x365   :  { %v464_v28 = vpop.xlane.xlu0 %463  ;;  %v470_v20 = vpop.xlane.xlu1 %469 }
 0x366   :  { %1812 = vpow2.f32 %v1522_v23  ;;  %v482_v40 = vadd.f32 %v2516_v47, %v464_v28  ;;  %v484_v60 = vadd.f32 %v470_v20, %v1976_v33 }
 0x368   :  { %v1521_v56 = vmul.f32 -1.442695, %v482_v40  ;;  %v1523_v2 = vmul.f32 -1.442695, %v484_v60 }
 0x369   :  { %v473_v27 = vpop.xlane.xlu0 %472  ;;  %v948_v57 = vpop.permute.xlu1 %947 }
 0x36a   :  { %1814 = vpow2.f32 %v1521_v56  ;;  %v485_v10 = vadd.f32 %v2520_v21, %v473_v27  ;;  %v2553_v56 = vld [vmem:[#allocation2 + $0xc8] sm:$0xff] }
 0x36b   :  { %v1809_v46 = vpop.eup %1808  ;;  %1816 = vpow2.f32 %v1523_v2 }
 0x36c   :  { %v1811_v29 = vpop.eup %1810  ;;  %v513_v14 = vadd.f32 1.0, %v1809_v46  ;;  %v1524_v3 = vmul.f32 -1.442695, %v485_v10  ;;  %v929_v10 = vadd.f32 %v2412_v16, %v2405_v51  ;;  %v971_v46 = vmul.f32 %v2002_v59, %v2511_v53  ;;  %v1862_v53 = vld [vmem:[#allocation2 + $0xb0] sm:$0xff] }
 0x36d   :  { %v512_v12 = vadd.f32 1.0, %v1811_v29  ;;  %v479_v24 = vpop.xlane.xlu0 %478 }
 0x36e   :  { %1818 = vrcp.f32 %v513_v14  ;;  %v487_v33 = vadd.f32 %v2523_v48, %v479_v24 }
 0x36f   :  { %1820 = vrcp.f32 %v512_v12 }
 0x370   :  { %v1813_v0 = vpop.eup %1812  ;;  %1822 = vpow2.f32 %v1524_v3  ;;  %v1526_v38 = vmul.f32 -1.442695, %v487_v33  ;;  %v973_v3 = vmul.f32 %v2018_v9, %v948_v57 }
 0x371   :  { %v515_v25 = vadd.f32 1.0, %v1813_v0 }
 0x372   :  { %1824 = vpow2.f32 %v1526_v38  ;;  %v1863_v38 = vld [vmem:[#allocation2 + $0xc0] sm:$0xff] }
 0x373   :  { %1826 = vrcp.f32 %v515_v25  ;;  %v2663_v25 = vld [vmem:[#allocation7_spill] sm:$0xff] }
 0x374   :  { %v1815_v26 = vpop.eup %1814 }
 0x375   :  { %v514_v63 = vadd.f32 1.0, %v1815_v26  ;;  %v1817_v44 = vpop.eup %1816  ;;  %v943_v39 = vpop.permute.xlu0 %942 }
 0x376   :  { %v516_v36 = vadd.f32 1.0, %v1817_v44  ;;  %v972_v41 = vmul.f32 %v943_v39, %v2662_v7 }
 0x377   :  { %1828 = vrcp.f32 %v514_v63 }
 0x378   :  { %v1819_v34 = vpop.eup %1818 }
 0x379   :  { %v1821_v22 = vpop.eup %1820  ;;  %1098 = vperm.xlu1 %1774, %v1819_v34   ;;  %v958_v35 = vpop.permute.xlu0 %957 }
 0x37a   :  { %v1823_v31 = vpop.eup %1822  ;;  %1093 = vperm.xlu0 %1775, %v1821_v22   ;;  %v975_v24 = vmul.f32 %v2060_v37, %v958_v35 }
 0x37b   :  { %v517_v30 = vadd.f32 1.0, %v1823_v31 }
 0x37c   :  { %v1825_v6 = vpop.eup %1824 }
 0x37d   :  { %v1827_v52 = vpop.eup %1826  ;;  %1830 = vrcp.f32 %v517_v30  ;;  %v519_v49 = vadd.f32 1.0, %v1825_v6  ;;  %v963_v20 = vpop.permute.xlu0 %962 }
 0x37e   :  { %1108 = vperm.xlu0 %1775, %v1827_v52   ;;  %1832 = vrcp.f32 %v516_v36 }
 0x37f   :  { %1834 = vrcp.f32 %v519_v49 }
 0x381   :  { %v1829_v61 = vpop.eup %1828  ;;  %v989_v14 = vpop.permute.xlu0 %988 }
 0x382   :  { %1060 = vrot.lane.b32.xlu0 %v927_v50, %s1905_s20  ;;  %1103 = vperm.xlu1 %1774, %v1829_v61  }
 0x385   :  { %v993_v33 = vpop.permute.xlu0 %992 }
 0x387   :  { %v1831_v5 = vpop.eup %1830 }
 0x388   :  { %1118 = vperm.xlu1 %1774, %v1831_v5   ;;  %v1833_v32 = vpop.eup %1832 }
 0x389   :  { %v1835_v4 = vpop.eup %1834  ;;  %v1021_v16 = vpop.permute.xlu0 %1020 }
 0x38a   :  { %v1076_v30 = vsel %vm1074_vm0, %v989_v14, %v1021_v16  ;;  %v1909_v14 = vmov 0.0|0.0  }
 0x38b   :  { %1717 = vmatprep.subr.bf16.mxu1 %v1909_v14 }
 0x38c   :  { %1113 = vperm.xlu1 %1774, %v1833_v32  }
 0x38d   :  { %v1025_v9 = vpop.permute.xlu0 %1024 }
 0x38e   :  { %v1078_v32 = vsel %vm1074_vm0, %v993_v33, %v1025_v9 }
 0x390   :  { %1128 = vperm.xlu1 %1774, %v1835_v4  }
 0x391   :  { %v997_v37 = vpop.permute.xlu0 %996 }
 0x394   :  { %1058 = vrot.lane.b32.xlu1 %v926_v13, %s1905_s20 }
 0x395   :  { %v1029_v63 = vpop.permute.xlu0 %1028 }
 0x398   :  { %1062 = vrot.lane.b32.xlu1 %v928_v19, %s1905_s20 }
 0x399   :  { %v1053_v44 = vpop.permute.xlu0 %1052 }
 0x39a   :  { %v476_v18 = vpop.xlane.xlu1 %475  ;;  %v1084_v52 = vsel %vm455_vm15, %v1076_v30, %v1053_v44 }
 0x39b   :  { %v486_v45 = vadd.f32 %v2534_v55, %v476_v18 }
 0x39c   :  { %1147 = vrot.lane.b32.xlu1 %v2444_v62, %s1906_s21 }
 0x39d   :  { %v1525_v58 = vmul.f32 -1.442695, %v486_v45  ;;  %v1057_v34 = vpop.permute.xlu0 %1056 }
 0x39e   :  { %v953_v8 = vpop.permute.xlu1 %952  ;;  %v1086_v4 = vsel %vm455_vm15, %v1078_v32, %v1057_v34 }
 0x39f   :  { %1836 = vpow2.f32 %v1525_v58  ;;  %v974_v15 = vmul.f32 %v953_v8, %v2071_v43  ;;  %v976_v43 = vmul.f32 %v963_v20, %v2659_v42  ;;  %v1080_v58 = vsel %vm1074_vm0, %v997_v37, %v1029_v63 }
 0x3a0   :  { %1151 = vrot.lane.b32.xlu1 %v972_v41, %s1906_s21 }
 0x3a1   :  { %v1001_v22 = vpop.permute.xlu0 %1000 }
 0x3a2   :  { %v968_v11 = vpop.permute.xlu1 %967 }
 0x3a3   :  { %v977_v26 = vmul.f32 %v2663_v25, %v968_v11 }
 0x3a4   :  { %1155 = vrot.lane.b32.xlu1 %v974_v15, %s1906_s21 }
 0x3a5   :  { %v1033_v31 = vpop.permute.xlu0 %1032 }
 0x3a6   :  { %v987_v1 = vpop.permute.xlu1 %986 }
 0x3a8   :  { %1211 = vrot.lane.b32.xlu1 %v2543_v54, %s1896_s12 }
 0x3a9   :  { %v1837_v62 = vpop.eup %1836 }
 0x3aa   :  { %v518_v23 = vadd.f32 1.0, %v1837_v62  ;;  %v2547_v28 = vpop.permute.xlu1 %990 }
 0x3ac   :  { %1838 = vrcp.f32 %v518_v23  ;;  %1215 = vrot.lane.b32.xlu1 %v2516_v47, %s1896_s12 }
 0x3ae   :  { %v1019_v40 = vpop.permute.xlu1 %1018 }
 0x3af   :  { %v1075_v6 = vsel %vm1074_vm0, %v987_v1, %v1019_v40 }
 0x3b0   :  { %1159 = vrot.lane.b32.xlu1 %v976_v43, %s1906_s21 }
 0x3b2   :  { %v1023_v60 = vpop.permute.xlu1 %1022 }
 0x3b3   :  { %v1077_v19 = vsel %vm1074_vm0, %v2547_v28, %v1023_v60  ;;  %v1082_v60 = vsel %vm1074_vm0, %v1001_v22, %v1033_v31 }
 0x3b4   :  { %1219 = vrot.lane.b32.xlu1 %v2553_v56, %s1896_s12 }
 0x3b6   :  { %v1839_v2 = vpop.eup %1838  ;;  %v2557_v27 = vpop.permute.xlu1 %994 }
 0x3b7   :  { %1123 = vperm.xlu0 %1775, %v1839_v2  }
 0x3b8   :  { %1223 = vrot.lane.b32.xlu1 %v2534_v55, %s1896_s12 }
 0x3ba   :  { %v1027_v42 = vpop.permute.xlu1 %1026 }
 0x3bb   :  { %1064 = vrot.lane.b32.xlu0 %v929_v10, %s1905_s20  ;;  %v1079_v35 = vsel %vm1074_vm0, %v2557_v27, %v1027_v42  ;;  %v54_v27 = vld [vmem:[#allocation2 + $0xe8] sm:$0xff]  ;;  %v55_v42 = vld [vmem:[#allocation2 + $0xf0] sm:$0xff] }
 0x3be   :  { %v1051_v29 = vpop.permute.xlu1 %1050 }
 0x3bf   :  { %1149 = vrot.lane.b32.xlu0 %v971_v46, %s1906_s21  ;;  %v1083_v61 = vsel %vm455_vm15, %v1075_v6, %v1051_v29  ;;  %v56_v29 = vld [vmem:[#allocation2 + $0xf8] sm:$0xff] }
 0x3c2   :  { %v1055_v12 = vpop.permute.xlu1 %1054 }
 0x3c3   :  { %1153 = vrot.lane.b32.xlu0 %v973_v3, %s1906_s21  ;;  %v1085_v57 = vsel %vm455_vm15, %v1077_v19, %v1055_v12  ;;  %v57_v3 = vld [vmem:[#allocation2 + $0x100] sm:$0xff] }
 0x3c6   :  { %v999_v0 = vpop.permute.xlu1 %998 }
 0x3c7   :  { %1157 = vrot.lane.b32.xlu0 %v975_v24, %s1906_s21 }
 0x3ca   :  { %v1031_v51 = vpop.permute.xlu1 %1030 }
 0x3cb   :  { %v1081_v59 = vsel %vm1074_vm0, %v999_v0, %v1031_v51  ;;  %1213 = vrot.lane.b32.xlu0 %v1862_v53, %s1896_s12 }
 0x3cf   :  { %1217 = vrot.lane.b32.xlu0 %v1863_v38, %s1896_s12 }
 0x3d3   :  { %1161 = vrot.lane.b32.xlu0 %v977_v26, %s1906_s21 }
 0x3d7   :  { %1221 = vrot.lane.b32.xlu0 %v2520_v21, %s1896_s12 }
 0x3db   :  { %1225 = vrot.lane.b32.xlu0 %v2523_v48, %s1896_s12 }
 0x3f8   :  { %v1099_v36 = vpop.permute.xlu1 %1098 }
 0x3f9   :  { %v1132_v49 = vmul.f32 %v1099_v36, %v1084_v52  ;;  %v1094_v50 = vpop.permute.xlu0 %1093 }
 0x3fa   :  { %v1131_v5 = vmul.f32 %v1094_v50, %v1083_v61 }
 0x3fb   :  { %1181 = vrot.lane.b32.xlu0 %v1132_v49, %s1907_s22 }
 0x3fc   :  { %1179 = vrot.lane.b32.xlu1 %v1131_v5, %s1907_s22 }
 0x3fd   :  { %v1109_v17 = vpop.permute.xlu0 %1108 }
 0x3fe   :  { %v1134_v13 = vmul.f32 %v1109_v17, %v1086_v4 }
 0x400   :  { %1185 = vrot.lane.b32.xlu0 %v1134_v13, %s1907_s22 }
 0x401   :  { %v1104_v18 = vpop.permute.xlu1 %1103  ;;  %v1061_v45 = vpop.permute.xlu0 %1060 }
 0x402   :  { %v1133_v39 = vmul.f32 %v1104_v18, %v1085_v57  ;;  %v1088_v7 = vsel %vm455_vm15, %v1080_v58, %v1061_v45 }
 0x404   :  { %1183 = vrot.lane.b32.xlu1 %v1133_v39, %s1907_s22 }
 0x407   :  { %v1119_v41 = vpop.permute.xlu1 %1118 }
 0x408   :  { %v1136_v8 = vmul.f32 %v1119_v41, %v1088_v7 }
 0x40a   :  { %1189 = vrot.lane.b32.xlu0 %v1136_v8, %s1907_s22 }
 0x40b   :  { %v1114_v15 = vpop.permute.xlu1 %1113 }
 0x40f   :  { %v1129_v11 = vpop.permute.xlu1 %1128 }
 0x413   :  { %v1059_v1 = vpop.permute.xlu1 %1058 }
 0x414   :  { %v1087_v62 = vsel %vm455_vm15, %v1079_v35, %v1059_v1 }
 0x415   :  { %v1135_v23 = vmul.f32 %v1114_v15, %v1087_v62 }
 0x417   :  { %1187 = vrot.lane.b32.xlu1 %v1135_v23, %s1907_s22  ;;  %v1063_v28 = vpop.permute.xlu1 %1062 }
 0x418   :  { %v1089_v43 = vsel %vm455_vm15, %v1081_v59, %v1063_v28 }
 0x436   :  { %v1124_v20 = vpop.permute.xlu0 %1123 }
 0x437   :  { %v1137_v40 = vmul.f32 %v1124_v20, %v1089_v43 }
 0x439   :  { %1191 = vrot.lane.b32.xlu1 %v1137_v40, %s1907_s22 }
 0x43a   :  { %v1065_v2 = vpop.permute.xlu0 %1064 }
 0x43b   :  { %v1090_v10 = vsel %vm455_vm15, %v1082_v60, %v1065_v2 }
 0x43c   :  { %v1138_v46 = vmul.f32 %v1129_v11, %v1090_v10 }
 0x43d   :  { %1251 = vrot.lane.b32.xlu1 %v2543_v54, %s1908_s23  ;;  %v1718_v54 = vpack.c.bf16 %v55_v42, %v54_v27 }
 0x43e   :  { %1193 = vrot.lane.b32.xlu0 %v1138_v46, %s1907_s22 }
 0x43f   :  { %1719 = vmatpush3.bf16.msra.mxu1 %v1718_v54 }
 0x440   :  { %1720 = vmatprep.subr.bf16.mxu1 %v1909_v14 }
 0x441   :  { %1255 = vrot.lane.b32.xlu1 %v2516_v47, %s1908_s23  ;;  %v2664_v47 = vmov 0.0  }
 0x442   :  { %1253 = vrot.lane.b32.xlu0 %v1862_v53, %s1908_s23  ;;  %1663 = vmatprep.mubr.msk.f32.mxu1 %vm1910_vm1, %v2664_v47 }
 0x445   :  { %1259 = vrot.lane.b32.xlu1 %v2553_v56, %s1908_s23  ;;  %v1721_v56 = vpack.c.bf16 %v57_v3, %v56_v29 }
 0x446   :  { %1257 = vrot.lane.b32.xlu0 %v1863_v38, %s1908_s23 }
 0x447   :  { %1722 = vmatpush3.bf16.msra.mxu1 %v1721_v56 }
 0x448   :  { %1661 = vmatprep.subr.mxu1 %v2664_v47 }
 0x449   :  { %1263 = vrot.lane.b32.xlu1 %v2534_v55, %s1908_s23  ;;  %v1150_v55 = vpop.permute.xlu0 %1149 }
 0x44a   :  { %1261 = vrot.lane.b32.xlu0 %v2520_v21, %s1908_s23  ;;  %v58_v21 = vld [vmem:[#allocation2 + $0x108] sm:$0xff] }
 0x44b   :  { %1662 = vmatpush3.msra.mxu1 %v58_v21 }
 0x44c   :  { %1723 = vmatprep.subr.bf16.mxu1 %v1909_v14 }
 0x44d   :  { %v1154_v24 = vpop.permute.xlu0 %1153 }
 0x44e   :  { %1265 = vrot.lane.b32.xlu0 %v2523_v48, %s1908_s23  ;;  %v1148_v48 = vpop.permute.xlu1 %1147 }
 0x451   :  { %v1158_v0 = vpop.permute.xlu0 %1157 }
 0x452   :  { %v1152_v12 = vpop.permute.xlu1 %1151 }
 0x455   :  { %v1214_v16 = vpop.permute.xlu0 %1213 }
 0x456   :  { %v1156_v33 = vpop.permute.xlu1 %1155 }
 0x459   :  { %v1218_v53 = vpop.permute.xlu0 %1217 }
 0x45a   :  { %v1212_v51 = vpop.permute.xlu1 %1211 }
 0x45d   :  { %v1162_v9 = vpop.permute.xlu0 %1161 }
 0x45e   :  { %v1216_v59 = vpop.permute.xlu1 %1215 }
 0x461   :  { %v1222_v25 = vpop.permute.xlu0 %1221 }
 0x462   :  { %v1160_v38 = vpop.permute.xlu1 %1159 }
 0x465   :  { %v1226_v37 = vpop.permute.xlu0 %1225 }
 0x466   :  { %v1220_v26 = vpop.permute.xlu1 %1219 }
 0x46a   :  { %v1224_v63 = vpop.permute.xlu1 %1223 }
 0x46d   :  { %v1182_v44 = vpop.permute.xlu0 %1181 }
 0x46e   :  { %v1180_v34 = vpop.permute.xlu1 %1179  ;;  %v1204_v30 = vsel %vm455_vm15, %v1150_v55, %v1182_v44 }
 0x46f   :  { %v1203_v22 = vsel %vm455_vm15, %v1148_v48, %v1180_v34  ;;  %v1236_v49 = vadd.f32 %v1214_v16, %v1204_v30 }
 0x470   :  { %v1235_v6 = vadd.f32 %v1212_v51, %v1203_v22 }
 0x472   :  { %v1186_v52 = vpop.permute.xlu0 %1185  ;;  %1840 = vtanh.f32 %v1235_v6 }
 0x473   :  { %v1206_v61 = vsel %vm455_vm15, %v1154_v24, %v1186_v52  ;;  %1842 = vtanh.f32 %v1236_v49 }
 0x474   :  { %v1238_v17 = vadd.f32 %v1218_v53, %v1206_v61 }
 0x476   :  { %v1184_v31 = vpop.permute.xlu1 %1183 }
 0x477   :  { %v1205_v36 = vsel %vm455_vm15, %v1152_v12, %v1184_v31 }
 0x478   :  { %v1237_v5 = vadd.f32 %v1216_v59, %v1205_v36 }
 0x47a   :  { %1844 = vtanh.f32 %v1237_v5 }
 0x47b   :  { %1846 = vtanh.f32 %v1238_v17 }
 0x47c   :  { %v1190_v32 = vpop.permute.xlu0 %1189  ;;  %v1841_v8 = vpop.eup %1840 }
 0x47d   :  { %v1208_v13 = vsel %vm455_vm15, %v1158_v0, %v1190_v32  ;;  %v1843_v1 = vpop.eup %1842 }
 0x47e   :  { %v1240_v39 = vadd.f32 %v1222_v25, %v1208_v13 }
 0x484   :  { %v1845_v28 = vpop.eup %1844 }
 0x485   :  { %v1847_v2 = vpop.eup %1846 }
 0x489   :  { %v1188_v50 = vpop.permute.xlu1 %1187 }
 0x48a   :  { %v1207_v4 = vsel %vm455_vm15, %v1156_v33, %v1188_v50 }
 0x48b   :  { %v1239_v57 = vadd.f32 %v1220_v26, %v1207_v4 }
 0x48d   :  { %1848 = vtanh.f32 %v1239_v57 }
 0x48e   :  { %1850 = vtanh.f32 %v1240_v39  ;;  %v60_v39 = vld [vmem:[#allocation2 + $0x118] sm:$0xff] }
 0x497   :  { %v1849_v42 = vpop.eup %1848 }
 0x498   :  { %v1851_v21 = vpop.eup %1850 }
 0x4ab   :  { %v1192_v19 = vpop.permute.xlu1 %1191 }
 0x4ac   :  { %v1209_v18 = vsel %vm455_vm15, %v1160_v38, %v1192_v19 }
 0x4ad   :  { %v1241_v58 = vadd.f32 %v1224_v63, %v1209_v18 }
 0x4af   :  { %v1252_v45 = vpop.permute.xlu1 %1251  ;;  %1852 = vtanh.f32 %v1241_v58 }
 0x4b0   :  { %v1194_v7 = vpop.permute.xlu0 %1193  ;;  %v1275_v11 = vadd.f32 %v1841_v8, %v1252_v45  ;;  %v61_v45 = vld [vmem:[#allocation2 + $0x120] sm:$0xff] }
 0x4b1   :  { %v1210_v41 = vsel %vm455_vm15, %v1162_v9, %v1194_v7 }
 0x4b2   :  { %v1242_v15 = vadd.f32 %v1226_v37, %v1210_v41  ;;  %v1284_v20 = vsel %vm1283_vm2, %v1275_v11, -inf }
 0x4b3   :  { %v1256_v35 = vpop.permute.xlu1 %1255 }
 0x4b4   :  { %v1254_v62 = vpop.permute.xlu0 %1253  ;;  %1854 = vtanh.f32 %v1242_v15  ;;  %v1277_v43 = vadd.f32 %v1845_v28, %v1256_v35  ;;  %v1724_v15 = vpack.c.bf16 %v61_v45, %v60_v39  ;;  %v1535_v28 = vld [vmem:[#allocation2 + $0x110] ss:$0 sm:$0xff] }
 0x4b5   :  { %v1276_v23 = vadd.f32 %v1843_v1, %v1254_v62  ;;  %v62_v1 = vld [vmem:[#allocation2 + $0x128] sm:$0xff]  ;;  %v63_v62 = vld [vmem:[#allocation2 + $0x130] sm:$0xff] }
 0x4b6   :  { %v1293_v54 = vsel %vm1283_vm2, %v1277_v43, -inf }
 0x4b7   :  { %v1285_v40 = vsel %vm1283_vm2, %v1276_v23, -inf  ;;  %v1260_v60 = vpop.permute.xlu1 %1259  ;;  %v1727_v23 = vpack.c.bf16 %v63_v62, %v62_v1 }
 0x4b8   :  { %v1286_v10 = vmax.f32 %v1284_v20, %v1285_v40  ;;  %v1258_v46 = vpop.permute.xlu0 %1257  ;;  %v1279_v3 = vadd.f32 %v1849_v42, %v1260_v60 }
 0x4b9   :  { %v1278_v27 = vadd.f32 %v1847_v2, %v1258_v46  ;;  %v1853_v33 = vpop.eup %1852  ;;  %v1537_v2 = vld [vmem:[#allocation2 + $0x138] ss:$0 sm:$0xff] }
 0x4ba   :  { %v1287_v29 = vrot.slane %v1286_v10, 4  ;;  %v1302_v16 = vsel %vm1283_vm2, %v1279_v3, -inf }
 0x4bb   :  { %v1294_v56 = vsel %vm1283_vm2, %v1278_v27, -inf  ;;  %v1264_v55 = vpop.permute.xlu1 %1263 }
 0x4bc   :  { %v1295_v48 = vmax.f32 %v1293_v54, %v1294_v56  ;;  %v1262_v12 = vpop.permute.xlu0 %1261  ;;  %v1288_v0 = vmax.f32 %v1286_v10, %v1287_v29  ;;  %v1281_v59 = vadd.f32 %v1853_v33, %v1264_v55 }
 0x4bd   :  { %v1280_v24 = vadd.f32 %v1851_v21, %v1262_v12 }
 0x4be   :  { %v1296_v51 = vrot.slane %v1295_v48, 4  ;;  %v1855_v38 = vpop.eup %1854  ;;  %v1289_v63 = vrot.slane %v1288_v0, 2  ;;  %v1311_v22 = vsel %vm1283_vm2, %v1281_v59, -inf }
 0x4bf   :  { %v1303_v53 = vsel %vm1283_vm2, %v1280_v24, -inf }
 0x4c0   :  { %v1297_v9 = vmax.f32 %v1295_v48, %v1296_v51  ;;  %v1304_v25 = vmax.f32 %v1302_v16, %v1303_v53  ;;  %v1266_v26 = vpop.permute.xlu0 %1265  ;;  %v1290_v36 = vmax.f32 %v1288_v0, %v1289_v63 }
 0x4c1   :  { %v1282_v37 = vadd.f32 %v1855_v38, %v1266_v26 }
 0x4c2   :  { %v1298_v44 = vrot.slane %v1297_v9, 2  ;;  %v1305_v34 = vrot.slane %v1304_v25, 4  ;;  %v1291_v4 = vrot.slane %v1290_v36, 1 }
 0x4c3   :  { %v1312_v31 = vsel %vm1283_vm2, %v1282_v37, -inf }
 0x4c4   :  { %v1299_v30 = vmax.f32 %v1297_v9, %v1298_v44  ;;  %v1306_v6 = vmax.f32 %v1304_v25, %v1305_v34  ;;  %v1313_v52 = vmax.f32 %v1311_v22, %v1312_v31  ;;  %v1292_v58 = vmax.f32 %v1290_v36, %v1291_v4 }
 0x4c6   :  { %v1307_v49 = vrot.slane %v1306_v6, 2  ;;  %v1314_v50 = vrot.slane %v1313_v52, 4  ;;  %v1300_v61 = vrot.slane %v1299_v30, 1 }
 0x4c8   :  { %v1308_v5 = vmax.f32 %v1306_v6, %v1307_v49  ;;  %v1315_v32 = vmax.f32 %v1313_v52, %v1314_v50  ;;  %v1301_v19 = vmax.f32 %v1299_v30, %v1300_v61 }
 0x4ca   :  { %v1309_v17 = vrot.slane %v1308_v5, 1  ;;  %v1316_v13 = vrot.slane %v1315_v32, 2  ;;  %v1320_v8 = vsel %vm572_vm9, %v1292_v58, %v1301_v19 }
 0x4cc   :  { %v1317_v57 = vmax.f32 %v1315_v32, %v1316_v13  ;;  %v1310_v18 = vmax.f32 %v1308_v5, %v1309_v17 }
 0x4ce   :  { %v1318_v7 = vrot.slane %v1317_v57, 1  ;;  %v1321_v11 = vsel %vm546_vm13, %v1320_v8, %v1310_v18 }
 0x4d0   :  { %v1319_v41 = vmax.f32 %v1317_v57, %v1318_v7 }
 0x4d2   :  { %v1323_v35 = vsel %vm1322_vm3, %v1321_v11, %v1319_v41 }
 0x4d3   :  { %1664 = vmatmul.mubr.msk.f32.vlgmr.msra.gmra.mrb[8].mxu1 %vm1283_vm2, %v1323_v35 }
 0x4d4   :  { %1725 = vmatpush3.bf16.msra.mxu1 %v1724_v15  ;;  %1674 = vmatprep.mubr.msk.f32.mxu1 %vm1910_vm1, %v2664_v47 }
 0x4d5   :  { %1726 = vmatprep.subr.bf16.mxu1 %v1909_v14 }
 0x4d8   :  { %1728 = vmatpush3.bf16.msra.mxu1 %v1727_v23 }
 0x5a6   :  { %v1397_v20 = vpop.f32.mrb[8].mxu1 }
 0x5a7   :  { %v1398_v43 = vadd.f32 %v1535_v28, %v1397_v20  ;;  %v1665_v40 = vpop.f32.mrb[9].mxu1 }
 0x5a9   :  { %v1401_v60 = vmax.f32 %v1398_v43, 0.0 }
 0x5ab   :  { %1675 = vmatmul.mubr.msk.f32.vlgmr.msra.gmra.mrb[10].mxu1 %vm1406_vm4, %v1401_v60 }
 0x67e   :  { %v1476_v10 = vpop.f32.mrb[10].mxu1 }
 0x67f   :  { %v1477_v46 = vadd.f32 %v1537_v2, %v1476_v10  ;;  %v1676_v27 = vpop.f32.mrb[11].mxu1 }
 0x681   :  { %v1481_v42 = vrot.slane %v1477_v46, 2 }
 0x683   :  { %v1483_v47 = vmul.f32 %v1481_v42, %v1477_v46 }
 0x685   :  { %v1485_v29 = vsel %vm1484_vm5, %v1483_v47, 0.0 }
 0x686   :  { %1486 = vadd.xlane.f32.xlu1 %v1485_v29 }
 0x713   :  { %v1487_v14 = vpop.xlane.xlu1 %1486 }
 0x714   :  { %1489 = vst.msk [vmem:[%s2644_s2] sm:$0x3] %vm1488_vm6, %v1487_v14 }
 0x715   :  { %1494 = vsyncpa [#allocation3], 1 }

</bundles_post_ra>
